<compile_context>
chip_gen: v7x
topology: tpu7x:2x2x1
jax: 0.10.0
libtpu: 0.0.40
codegen_flags: <defaults>
</compile_context>

<pallas_src>
import functools

import jax
import jax.numpy as jnp
from jax.experimental import pallas as pl
from jax.experimental.pallas import tpu as pltpu


def _lstm_combine(gates, c):
    """Combine pre-activation gates (PyTorch order i, f, g, o along last axis) with cell c."""
    H = c.shape[-1]
    sg = jax.nn.sigmoid(gates)   # one full-width EUP pass: i, f, o live here
    th = jnp.tanh(gates)         # one full-width EUP pass: g lives here
    i = sg[:, 0 * H:1 * H]
    f = sg[:, 1 * H:2 * H]
    g = th[:, 2 * H:3 * H]
    o = sg[:, 3 * H:4 * H]
    c_new = f * c + i * g
    h_new = o * jnp.tanh(c_new)
    return h_new, c_new


def seq2seq_kernel(
    src_ref,      # [T_src*N, D]        time-major flattened source (row = t*N + n)
    enc_wih_ref,  # [D, 4H]             encoder weight_ih^T
    enc_whh_ref,  # [H, 4H]             encoder weight_hh^T
    enc_b_ref,    # [1, 4H]             encoder bias_ih + bias_hh
    dec_wih_ref,  # [D, 4H]             decoder weight_ih^T
    dec_whh_ref,  # [H, 4H]             decoder weight_hh^T
    dec_b_ref,    # [1, 4H]             decoder bias_ih + bias_hh
    lin_w_ref,    # [H, D]              linear weight^T
    lin_b_ref,    # [1, D]              linear bias
    out_ref,      # [target_len*N, D]   time-major flattened output
    h_hist_ref,   # scratch [(target_len-1)*N, H]  decoder hidden states h_1 .. h_{T-1}
    *, batch, target_len,
):
    f32 = jnp.float32
    N = batch
    H = enc_whh_ref.shape[0]
    D = lin_w_ref.shape[1]
    G = 4 * H
    t_src = src_ref.shape[0] // N
    t_out = target_len

    # ------------------------------ Encoder ------------------------------
    enc_whh = enc_whh_ref[...]
    # Hoisted input projection: all timesteps in one matmul, bias folded in.
    x_proj = (
        jnp.dot(src_ref[...], enc_wih_ref[...], preferred_element_type=f32)
        + enc_b_ref[...]
    )  # [T_src*N, 4H]

    h = jnp.zeros((N, H), f32)   # PyTorch default zero initial state
    c = jnp.zeros((N, H), f32)
    for t in range(t_src):       # fully unrolled; only h @ W_hh on the serial chain
        gates = x_proj[t * N:(t + 1) * N, :] + jnp.dot(
            h, enc_whh, preferred_element_type=f32)
        h, c = _lstm_combine(gates, c)

    # ------------------------------ Decoder ------------------------------
    dec_wih = dec_wih_ref[...]
    dec_whh = dec_whh_ref[...]
    dec_b = dec_b_ref[...]
    lin_w = lin_w_ref[...]
    lin_b = lin_b_ref[...]

    # Fold the output Linear into the recurrence (valid for steps t >= 2, where the
    # decoder input is the previous step's linear output):
    #   gates_t = h_{t-1} @ (dec_whh + lin_w @ dec_wih) + (dec_b + lin_b @ dec_wih)
    w_fused = dec_whh + jnp.dot(lin_w, dec_wih, preferred_element_type=f32)        # [H, 4H]
    b_fused = jnp.broadcast_to(
        dec_b + jnp.dot(lin_b, dec_wih, preferred_element_type=f32), (N, G))       # hoisted

    if t_out > 1:
        # Peeled t = 1: decoder input is trg[:, 0, :] == 0, so only the recurrent term.
        gates = jnp.dot(h, dec_whh, preferred_element_type=f32) + dec_b
        h, c = _lstm_combine(gates, c)
        h_hist_ref[pl.ds(0, N), :] = h

        for t in range(2, t_out):   # single matmul per step; h, c stay in registers
            gates = jnp.dot(h, w_fused, preferred_element_type=f32) + b_fused
            h, c = _lstm_combine(gates, c)
            h_hist_ref[pl.ds((t - 1) * N, N), :] = h

    # Deferred output projection: one batched matmul + bulk stores.
    out_ref[pl.ds(0, N), :] = jnp.zeros((N, D), out_ref.dtype)   # t = 0 row stays zero
    if t_out > 1:
        y = jnp.dot(h_hist_ref[...], lin_w, preferred_element_type=f32) + lin_b
        out_ref[pl.ds(N, (t_out - 1) * N), :] = y.astype(out_ref.dtype)


@functools.partial(jax.jit, static_argnames=("target_len",))
def seq2seq_forward(src, params, target_len):
    """src: [N, T_src, D] (batch-first, like PyTorch). Returns [N, target_len, D]."""
    N, T_src, D = src.shape
    H = params["enc_whh_t"].shape[0]

    # Time-major flattened rows (row index = t*N + n); layout plumbing stays in the wrapper.
    src_tm = jnp.transpose(src, (1, 0, 2)).reshape(T_src * N, D)

    out_flat = pl.pallas_call(
        functools.partial(seq2seq_kernel, batch=N, target_len=target_len),
        out_shape=jax.ShapeDtypeStruct((target_len * N, D), jnp.float32),
        scratch_shapes=[
            pltpu.VMEM((max(target_len - 1, 1) * N, H), jnp.float32),  # decoder h history
        ],
    )(
        src_tm,
        params["enc_wih_t"], params["enc_whh_t"], params["enc_b"],
        params["dec_wih_t"], params["dec_whh_t"], params["dec_b"],
        params["lin_w_t"], params["lin_b"],
    )
    return jnp.transpose(out_flat.reshape(target_len, N, D), (1, 0, 2))


def init_params(key, input_dim, hidden_dim, output_dim):
    """Deterministic init mimicking PyTorch LSTM/Linear uniform(-1/sqrt(H), 1/sqrt(H))."""
    H = hidden_dim
    bound = 1.0 / jnp.sqrt(jnp.float32(H))
    keys = jax.random.split(key, 10)

    def u(k, shape):
        return jax.random.uniform(k, shape, jnp.float32, -bound, bound)

    # Stored transposed so the kernel does x @ W^T directly.
    return {
        "enc_wih_t": u(keys[0], (input_dim, 4 * H)),
        "enc_whh_t": u(keys[1], (H, 4 * H)),
        "enc_b":     u(keys[2], (1, 4 * H)) + u(keys[3], (1, 4 * H)),  # bias_ih + bias_hh
        "dec_wih_t": u(keys[4], (output_dim, 4 * H)),
        "dec_whh_t": u(keys[5], (H, 4 * H)),
        "dec_b":     u(keys[6], (1, 4 * H)) + u(keys[7], (1, 4 * H)),
        "lin_w_t":   u(keys[8], (H, output_dim)),
        "lin_b":     u(keys[9], (1, output_dim)),
    }


def _reference_forward(src, params, target_len):
    """Pure-JAX reference matching the PyTorch module (trg=None, tf_ratio=None), unfused math."""
    N, T_src, D = src.shape
    H = params["enc_whh_t"].shape[0]
    h = jnp.zeros((N, H), jnp.float32)
    c = jnp.zeros((N, H), jnp.float32)

    def step(x, wih_t, whh_t, b, h, c):
        g = x @ wih_t + h @ whh_t + b
        i = jax.nn.sigmoid(g[:, :H])
        f = jax.nn.sigmoid(g[:, H:2 * H])
        gg = jnp.tanh(g[:, 2 * H:3 * H])
        o = jax.nn.sigmoid(g[:, 3 * H:])
        c = f * c + i * gg
        h = o * jnp.tanh(c)
        return h, c

    for t in range(T_src):
        h, c = step(src[:, t, :], params["enc_wih_t"], params["enc_whh_t"], params["enc_b"], h, c)

    out = jnp.zeros((N, target_len, D), jnp.float32)
    x = jnp.zeros((N, D), jnp.float32)
    for t in range(1, target_len):
        h, c = step(x, params["dec_wih_t"], params["dec_whh_t"], params["dec_b"], h, c)
        y = h @ params["lin_w_t"] + params["lin_b"]
        out = out.at[:, t, :].set(y)
        x = y
    return out


if __name__ == "__main__":
    # Small shapes: batch=2, src seq len=8, input_dim=output_dim=8, hidden=32, target_len=16.
    N, T_SRC, D, H, TARGET_LEN = 2, 8, 8, 32, 16

    key = jax.random.PRNGKey(0)
    k_src, k_params = jax.random.split(key)
    src = jax.random.normal(k_src, (N, T_SRC, D), jnp.float32)
    params = init_params(k_params, input_dim=D, hidden_dim=H, output_dim=D)

    out = seq2seq_forward(src, params, TARGET_LEN)
    out = jax.block_until_ready(out)

    ref = _reference_forward(src, params, TARGET_LEN)
    assert out.shape == (N, TARGET_LEN, D)
    assert jnp.allclose(out[:, 0, :], 0.0)
    # Fused recurrence weight (W_fused = dec_whh + lin_w @ dec_wih) changes FP associativity
    # slightly vs the per-step unfused reference, hence the 1e-4 tolerance.
    assert jnp.allclose(out, ref, atol=1e-4, rtol=1e-4), "mismatch vs pure-JAX reference"

    print("KERNEL_OK")
</pallas_src>

<mosaic_0001>
module attributes {stable_mosaic.version = 11 : i64} {
  func.func @seq2seq_kernel(%arg0: memref<16x8xf32, #tpu.memory_space<vmem>>, %arg1: memref<8x128xf32, #tpu.memory_space<vmem>>, %arg2: memref<32x128xf32, #tpu.memory_space<vmem>>, %arg3: memref<1x128xf32, #tpu.memory_space<vmem>>, %arg4: memref<8x128xf32, #tpu.memory_space<vmem>>, %arg5: memref<32x128xf32, #tpu.memory_space<vmem>>, %arg6: memref<1x128xf32, #tpu.memory_space<vmem>>, %arg7: memref<32x8xf32, #tpu.memory_space<vmem>>, %arg8: memref<1x8xf32, #tpu.memory_space<vmem>>, %arg9: memref<32x8xf32, #tpu.memory_space<vmem>>, %arg10: memref<30x32xf32, #tpu.memory_space<vmem>>) attributes {dimension_semantics = [], scalar_prefetch = 0 : i64, scratch_operands = 1 : i64, tpu.core_type = #tpu.core_type<tc>} {
    %c0 = arith.constant 0 : index
    %c0_0 = arith.constant 0 : index
    %0 = vector.load %arg2[%c0, %c0_0] : memref<32x128xf32, #tpu.memory_space<vmem>>, vector<32x128xf32>
    %c0_1 = arith.constant 0 : index
    %c0_2 = arith.constant 0 : index
    %1 = vector.load %arg0[%c0_1, %c0_2] : memref<16x8xf32, #tpu.memory_space<vmem>>, vector<16x8xf32>
    %c0_3 = arith.constant 0 : index
    %c0_4 = arith.constant 0 : index
    %2 = vector.load %arg1[%c0_3, %c0_4] : memref<8x128xf32, #tpu.memory_space<vmem>>, vector<8x128xf32>
    %cst = arith.constant dense<0.000000e+00> : vector<16x128xf32>
    %3 = tpu.matmul %1, %2, %cst {dimension_numbers = #tpu.dot_dimension_numbers<[1], [0], [0], [1], [0, 0, 1, 1], [], []>} : vector<16x8xf32>, vector<8x128xf32>, vector<16x128xf32> -> vector<16x128xf32>
    %c0_5 = arith.constant 0 : index
    %c0_6 = arith.constant 0 : index
    %4 = vector.load %arg3[%c0_5, %c0_6] : memref<1x128xf32, #tpu.memory_space<vmem>>, vector<1x128xf32>
    %5 = vector.broadcast %4 : vector<1x128xf32> to vector<16x128xf32>
    %6 = arith.addf %3, %5 : vector<16x128xf32>
    %cst_7 = arith.constant 0.000000e+00 : f32
    %7 = vector.broadcast %cst_7 : f32 to vector<2x32xf32>
    %cst_8 = arith.constant 0.000000e+00 : f32
    %8 = vector.broadcast %cst_8 : f32 to vector<2x32xf32>
    %9 = vector.extract_strided_slice %6 {offsets = [0, 0], sizes = [2, 128], strides = [1, 1]} : vector<16x128xf32> to vector<2x128xf32>
    %cst_9 = arith.constant dense<0.000000e+00> : vector<2x128xf32>
    %10 = tpu.matmul %7, %0, %cst_9 {dimension_numbers = #tpu.dot_dimension_numbers<[1], [0], [0], [1], [0, 0, 1, 1], [], []>} : vector<2x32xf32>, vector<32x128xf32>, vector<2x128xf32> -> vector<2x128xf32>
    %11 = arith.addf %9, %10 : vector<2x128xf32>
    %12 = arith.negf %11 : vector<2x128xf32>
    %13 = math.exp %12 : vector<2x128xf32>
    %cst_10 = arith.constant 1.000000e+00 : f32
    %14 = vector.broadcast %cst_10 : f32 to vector<2x128xf32>
    %15 = arith.addf %14, %13 : vector<2x128xf32>
    %16 = arith.divf %14, %15 : vector<2x128xf32>
    %17 = math.tanh %11 : vector<2x128xf32>
    %18 = vector.extract_strided_slice %16 {offsets = [0, 0], sizes = [2, 32], strides = [1, 1]} : vector<2x128xf32> to vector<2x32xf32>
    %19 = vector.extract_strided_slice %16 {offsets = [0, 32], sizes = [2, 32], strides = [1, 1]} : vector<2x128xf32> to vector<2x32xf32>
    %20 = vector.extract_strided_slice %17 {offsets = [0, 64], sizes = [2, 32], strides = [1, 1]} : vector<2x128xf32> to vector<2x32xf32>
    %21 = vector.extract_strided_slice %16 {offsets = [0, 96], sizes = [2, 32], strides = [1, 1]} : vector<2x128xf32> to vector<2x32xf32>
    %22 = arith.mulf %19, %8 : vector<2x32xf32>
    %23 = arith.mulf %18, %20 : vector<2x32xf32>
    %24 = arith.addf %22, %23 : vector<2x32xf32>
    %25 = math.tanh %24 : vector<2x32xf32>
    %26 = arith.mulf %21, %25 : vector<2x32xf32>
    %27 = vector.extract_strided_slice %6 {offsets = [2, 0], sizes = [2, 128], strides = [1, 1]} : vector<16x128xf32> to vector<2x128xf32>
    %cst_11 = arith.constant dense<0.000000e+00> : vector<2x128xf32>
    %28 = tpu.matmul %26, %0, %cst_11 {dimension_numbers = #tpu.dot_dimension_numbers<[1], [0], [0], [1], [0, 0, 1, 1], [], []>} : vector<2x32xf32>, vector<32x128xf32>, vector<2x128xf32> -> vector<2x128xf32>
    %29 = arith.addf %27, %28 : vector<2x128xf32>
    %30 = arith.negf %29 : vector<2x128xf32>
    %31 = math.exp %30 : vector<2x128xf32>
    %cst_12 = arith.constant 1.000000e+00 : f32
    %32 = vector.broadcast %cst_12 : f32 to vector<2x128xf32>
    %33 = arith.addf %32, %31 : vector<2x128xf32>
    %34 = arith.divf %32, %33 : vector<2x128xf32>
    %35 = math.tanh %29 : vector<2x128xf32>
    %36 = vector.extract_strided_slice %34 {offsets = [0, 0], sizes = [2, 32], strides = [1, 1]} : vector<2x128xf32> to vector<2x32xf32>
    %37 = vector.extract_strided_slice %34 {offsets = [0, 32], sizes = [2, 32], strides = [1, 1]} : vector<2x128xf32> to vector<2x32xf32>
    %38 = vector.extract_strided_slice %35 {offsets = [0, 64], sizes = [2, 32], strides = [1, 1]} : vector<2x128xf32> to vector<2x32xf32>
    %39 = vector.extract_strided_slice %34 {offsets = [0, 96], sizes = [2, 32], strides = [1, 1]} : vector<2x128xf32> to vector<2x32xf32>
    %40 = arith.mulf %37, %24 : vector<2x32xf32>
    %41 = arith.mulf %36, %38 : vector<2x32xf32>
    %42 = arith.addf %40, %41 : vector<2x32xf32>
    %43 = math.tanh %42 : vector<2x32xf32>
    %44 = arith.mulf %39, %43 : vector<2x32xf32>
    %45 = vector.extract_strided_slice %6 {offsets = [4, 0], sizes = [2, 128], strides = [1, 1]} : vector<16x128xf32> to vector<2x128xf32>
    %cst_13 = arith.constant dense<0.000000e+00> : vector<2x128xf32>
    %46 = tpu.matmul %44, %0, %cst_13 {dimension_numbers = #tpu.dot_dimension_numbers<[1], [0], [0], [1], [0, 0, 1, 1], [], []>} : vector<2x32xf32>, vector<32x128xf32>, vector<2x128xf32> -> vector<2x128xf32>
    %47 = arith.addf %45, %46 : vector<2x128xf32>
    %48 = arith.negf %47 : vector<2x128xf32>
    %49 = math.exp %48 : vector<2x128xf32>
    %cst_14 = arith.constant 1.000000e+00 : f32
    %50 = vector.broadcast %cst_14 : f32 to vector<2x128xf32>
    %51 = arith.addf %50, %49 : vector<2x128xf32>
    %52 = arith.divf %50, %51 : vector<2x128xf32>
    %53 = math.tanh %47 : vector<2x128xf32>
    %54 = vector.extract_strided_slice %52 {offsets = [0, 0], sizes = [2, 32], strides = [1, 1]} : vector<2x128xf32> to vector<2x32xf32>
    %55 = vector.extract_strided_slice %52 {offsets = [0, 32], sizes = [2, 32], strides = [1, 1]} : vector<2x128xf32> to vector<2x32xf32>
    %56 = vector.extract_strided_slice %53 {offsets = [0, 64], sizes = [2, 32], strides = [1, 1]} : vector<2x128xf32> to vector<2x32xf32>
    %57 = vector.extract_strided_slice %52 {offsets = [0, 96], sizes = [2, 32], strides = [1, 1]} : vector<2x128xf32> to vector<2x32xf32>
    %58 = arith.mulf %55, %42 : vector<2x32xf32>
    %59 = arith.mulf %54, %56 : vector<2x32xf32>
    %60 = arith.addf %58, %59 : vector<2x32xf32>
    %61 = math.tanh %60 : vector<2x32xf32>
    %62 = arith.mulf %57, %61 : vector<2x32xf32>
    %63 = vector.extract_strided_slice %6 {offsets = [6, 0], sizes = [2, 128], strides = [1, 1]} : vector<16x128xf32> to vector<2x128xf32>
    %cst_15 = arith.constant dense<0.000000e+00> : vector<2x128xf32>
    %64 = tpu.matmul %62, %0, %cst_15 {dimension_numbers = #tpu.dot_dimension_numbers<[1], [0], [0], [1], [0, 0, 1, 1], [], []>} : vector<2x32xf32>, vector<32x128xf32>, vector<2x128xf32> -> vector<2x128xf32>
    %65 = arith.addf %63, %64 : vector<2x128xf32>
    %66 = arith.negf %65 : vector<2x128xf32>
    %67 = math.exp %66 : vector<2x128xf32>
    %cst_16 = arith.constant 1.000000e+00 : f32
    %68 = vector.broadcast %cst_16 : f32 to vector<2x128xf32>
    %69 = arith.addf %68, %67 : vector<2x128xf32>
    %70 = arith.divf %68, %69 : vector<2x128xf32>
    %71 = math.tanh %65 : vector<2x128xf32>
    %72 = vector.extract_strided_slice %70 {offsets = [0, 0], sizes = [2, 32], strides = [1, 1]} : vector<2x128xf32> to vector<2x32xf32>
    %73 = vector.extract_strided_slice %70 {offsets = [0, 32], sizes = [2, 32], strides = [1, 1]} : vector<2x128xf32> to vector<2x32xf32>
    %74 = vector.extract_strided_slice %71 {offsets = [0, 64], sizes = [2, 32], strides = [1, 1]} : vector<2x128xf32> to vector<2x32xf32>
    %75 = vector.extract_strided_slice %70 {offsets = [0, 96], sizes = [2, 32], strides = [1, 1]} : vector<2x128xf32> to vector<2x32xf32>
    %76 = arith.mulf %73, %60 : vector<2x32xf32>
    %77 = arith.mulf %72, %74 : vector<2x32xf32>
    %78 = arith.addf %76, %77 : vector<2x32xf32>
    %79 = math.tanh %78 : vector<2x32xf32>
    %80 = arith.mulf %75, %79 : vector<2x32xf32>
    %81 = vector.extract_strided_slice %6 {offsets = [8, 0], sizes = [2, 128], strides = [1, 1]} : vector<16x128xf32> to vector<2x128xf32>
    %cst_17 = arith.constant dense<0.000000e+00> : vector<2x128xf32>
    %82 = tpu.matmul %80, %0, %cst_17 {dimension_numbers = #tpu.dot_dimension_numbers<[1], [0], [0], [1], [0, 0, 1, 1], [], []>} : vector<2x32xf32>, vector<32x128xf32>, vector<2x128xf32> -> vector<2x128xf32>
    %83 = arith.addf %81, %82 : vector<2x128xf32>
    %84 = arith.negf %83 : vector<2x128xf32>
    %85 = math.exp %84 : vector<2x128xf32>
    %cst_18 = arith.constant 1.000000e+00 : f32
    %86 = vector.broadcast %cst_18 : f32 to vector<2x128xf32>
    %87 = arith.addf %86, %85 : vector<2x128xf32>
    %88 = arith.divf %86, %87 : vector<2x128xf32>
    %89 = math.tanh %83 : vector<2x128xf32>
    %90 = vector.extract_strided_slice %88 {offsets = [0, 0], sizes = [2, 32], strides = [1, 1]} : vector<2x128xf32> to vector<2x32xf32>
    %91 = vector.extract_strided_slice %88 {offsets = [0, 32], sizes = [2, 32], strides = [1, 1]} : vector<2x128xf32> to vector<2x32xf32>
    %92 = vector.extract_strided_slice %89 {offsets = [0, 64], sizes = [2, 32], strides = [1, 1]} : vector<2x128xf32> to vector<2x32xf32>
    %93 = vector.extract_strided_slice %88 {offsets = [0, 96], sizes = [2, 32], strides = [1, 1]} : vector<2x128xf32> to vector<2x32xf32>
    %94 = arith.mulf %91, %78 : vector<2x32xf32>
    %95 = arith.mulf %90, %92 : vector<2x32xf32>
    %96 = arith.addf %94, %95 : vector<2x32xf32>
    %97 = math.tanh %96 : vector<2x32xf32>
    %98 = arith.mulf %93, %97 : vector<2x32xf32>
    %99 = vector.extract_strided_slice %6 {offsets = [10, 0], sizes = [2, 128], strides = [1, 1]} : vector<16x128xf32> to vector<2x128xf32>
    %cst_19 = arith.constant dense<0.000000e+00> : vector<2x128xf32>
    %100 = tpu.matmul %98, %0, %cst_19 {dimension_numbers = #tpu.dot_dimension_numbers<[1], [0], [0], [1], [0, 0, 1, 1], [], []>} : vector<2x32xf32>, vector<32x128xf32>, vector<2x128xf32> -> vector<2x128xf32>
    %101 = arith.addf %99, %100 : vector<2x128xf32>
    %102 = arith.negf %101 : vector<2x128xf32>
    %103 = math.exp %102 : vector<2x128xf32>
    %cst_20 = arith.constant 1.000000e+00 : f32
    %104 = vector.broadcast %cst_20 : f32 to vector<2x128xf32>
    %105 = arith.addf %104, %103 : vector<2x128xf32>
    %106 = arith.divf %104, %105 : vector<2x128xf32>
    %107 = math.tanh %101 : vector<2x128xf32>
    %108 = vector.extract_strided_slice %106 {offsets = [0, 0], sizes = [2, 32], strides = [1, 1]} : vector<2x128xf32> to vector<2x32xf32>
    %109 = vector.extract_strided_slice %106 {offsets = [0, 32], sizes = [2, 32], strides = [1, 1]} : vector<2x128xf32> to vector<2x32xf32>
    %110 = vector.extract_strided_slice %107 {offsets = [0, 64], sizes = [2, 32], strides = [1, 1]} : vector<2x128xf32> to vector<2x32xf32>
    %111 = vector.extract_strided_slice %106 {offsets = [0, 96], sizes = [2, 32], strides = [1, 1]} : vector<2x128xf32> to vector<2x32xf32>
    %112 = arith.mulf %109, %96 : vector<2x32xf32>
    %113 = arith.mulf %108, %110 : vector<2x32xf32>
    %114 = arith.addf %112, %113 : vector<2x32xf32>
    %115 = math.tanh %114 : vector<2x32xf32>
    %116 = arith.mulf %111, %115 : vector<2x32xf32>
    %117 = vector.extract_strided_slice %6 {offsets = [12, 0], sizes = [2, 128], strides = [1, 1]} : vector<16x128xf32> to vector<2x128xf32>
    %cst_21 = arith.constant dense<0.000000e+00> : vector<2x128xf32>
    %118 = tpu.matmul %116, %0, %cst_21 {dimension_numbers = #tpu.dot_dimension_numbers<[1], [0], [0], [1], [0, 0, 1, 1], [], []>} : vector<2x32xf32>, vector<32x128xf32>, vector<2x128xf32> -> vector<2x128xf32>
    %119 = arith.addf %117, %118 : vector<2x128xf32>
    %120 = arith.negf %119 : vector<2x128xf32>
    %121 = math.exp %120 : vector<2x128xf32>
    %cst_22 = arith.constant 1.000000e+00 : f32
    %122 = vector.broadcast %cst_22 : f32 to vector<2x128xf32>
    %123 = arith.addf %122, %121 : vector<2x128xf32>
    %124 = arith.divf %122, %123 : vector<2x128xf32>
    %125 = math.tanh %119 : vector<2x128xf32>
    %126 = vector.extract_strided_slice %124 {offsets = [0, 0], sizes = [2, 32], strides = [1, 1]} : vector<2x128xf32> to vector<2x32xf32>
    %127 = vector.extract_strided_slice %124 {offsets = [0, 32], sizes = [2, 32], strides = [1, 1]} : vector<2x128xf32> to vector<2x32xf32>
    %128 = vector.extract_strided_slice %125 {offsets = [0, 64], sizes = [2, 32], strides = [1, 1]} : vector<2x128xf32> to vector<2x32xf32>
    %129 = vector.extract_strided_slice %124 {offsets = [0, 96], sizes = [2, 32], strides = [1, 1]} : vector<2x128xf32> to vector<2x32xf32>
    %130 = arith.mulf %127, %114 : vector<2x32xf32>
    %131 = arith.mulf %126, %128 : vector<2x32xf32>
    %132 = arith.addf %130, %131 : vector<2x32xf32>
    %133 = math.tanh %132 : vector<2x32xf32>
    %134 = arith.mulf %129, %133 : vector<2x32xf32>
    %135 = vector.extract_strided_slice %6 {offsets = [14, 0], sizes = [2, 128], strides = [1, 1]} : vector<16x128xf32> to vector<2x128xf32>
    %cst_23 = arith.constant dense<0.000000e+00> : vector<2x128xf32>
    %136 = tpu.matmul %134, %0, %cst_23 {dimension_numbers = #tpu.dot_dimension_numbers<[1], [0], [0], [1], [0, 0, 1, 1], [], []>} : vector<2x32xf32>, vector<32x128xf32>, vector<2x128xf32> -> vector<2x128xf32>
    %137 = arith.addf %135, %136 : vector<2x128xf32>
    %138 = arith.negf %137 : vector<2x128xf32>
    %139 = math.exp %138 : vector<2x128xf32>
    %cst_24 = arith.constant 1.000000e+00 : f32
    %140 = vector.broadcast %cst_24 : f32 to vector<2x128xf32>
    %141 = arith.addf %140, %139 : vector<2x128xf32>
    %142 = arith.divf %140, %141 : vector<2x128xf32>
    %143 = math.tanh %137 : vector<2x128xf32>
    %144 = vector.extract_strided_slice %142 {offsets = [0, 0], sizes = [2, 32], strides = [1, 1]} : vector<2x128xf32> to vector<2x32xf32>
    %145 = vector.extract_strided_slice %142 {offsets = [0, 32], sizes = [2, 32], strides = [1, 1]} : vector<2x128xf32> to vector<2x32xf32>
    %146 = vector.extract_strided_slice %143 {offsets = [0, 64], sizes = [2, 32], strides = [1, 1]} : vector<2x128xf32> to vector<2x32xf32>
    %147 = vector.extract_strided_slice %142 {offsets = [0, 96], sizes = [2, 32], strides = [1, 1]} : vector<2x128xf32> to vector<2x32xf32>
    %148 = arith.mulf %145, %132 : vector<2x32xf32>
    %149 = arith.mulf %144, %146 : vector<2x32xf32>
    %150 = arith.addf %148, %149 : vector<2x32xf32>
    %151 = math.tanh %150 : vector<2x32xf32>
    %152 = arith.mulf %147, %151 : vector<2x32xf32>
    %c0_25 = arith.constant 0 : index
    %c0_26 = arith.constant 0 : index
    %153 = vector.load %arg4[%c0_25, %c0_26] : memref<8x128xf32, #tpu.memory_space<vmem>>, vector<8x128xf32>
    %c0_27 = arith.constant 0 : index
    %c0_28 = arith.constant 0 : index
    %154 = vector.load %arg5[%c0_27, %c0_28] : memref<32x128xf32, #tpu.memory_space<vmem>>, vector<32x128xf32>
    %c0_29 = arith.constant 0 : index
    %c0_30 = arith.constant 0 : index
    %155 = vector.load %arg6[%c0_29, %c0_30] : memref<1x128xf32, #tpu.memory_space<vmem>>, vector<1x128xf32>
    %c0_31 = arith.constant 0 : index
    %c0_32 = arith.constant 0 : index
    %156 = vector.load %arg7[%c0_31, %c0_32] : memref<32x8xf32, #tpu.memory_space<vmem>>, vector<32x8xf32>
    %c0_33 = arith.constant 0 : index
    %c0_34 = arith.constant 0 : index
    %157 = vector.load %arg8[%c0_33, %c0_34] : memref<1x8xf32, #tpu.memory_space<vmem>>, vector<1x8xf32>
    %cst_35 = arith.constant dense<0.000000e+00> : vector<32x128xf32>
    %158 = tpu.matmul %156, %153, %cst_35 {dimension_numbers = #tpu.dot_dimension_numbers<[1], [0], [0], [1], [0, 0, 1, 1], [], []>} : vector<32x8xf32>, vector<8x128xf32>, vector<32x128xf32> -> vector<32x128xf32>
    %159 = arith.addf %154, %158 : vector<32x128xf32>
    %cst_36 = arith.constant dense<0.000000e+00> : vector<1x128xf32>
    %160 = tpu.matmul %157, %153, %cst_36 {dimension_numbers = #tpu.dot_dimension_numbers<[1], [0], [0], [1], [0, 0, 1, 1], [], []>} : vector<1x8xf32>, vector<8x128xf32>, vector<1x128xf32> -> vector<1x128xf32>
    %161 = arith.addf %155, %160 : vector<1x128xf32>
    %162 = vector.shape_cast %161 : vector<1x128xf32> to vector<1x128xf32>
    %163 = vector.broadcast %162 : vector<1x128xf32> to vector<2x128xf32>
    %cst_37 = arith.constant dense<0.000000e+00> : vector<2x128xf32>
    %164 = tpu.matmul %152, %154, %cst_37 {dimension_numbers = #tpu.dot_dimension_numbers<[1], [0], [0], [1], [0, 0, 1, 1], [], []>} : vector<2x32xf32>, vector<32x128xf32>, vector<2x128xf32> -> vector<2x128xf32>
    %165 = vector.broadcast %155 : vector<1x128xf32> to vector<2x128xf32>
    %166 = arith.addf %164, %165 : vector<2x128xf32>
    %167 = arith.negf %166 : vector<2x128xf32>
    %168 = math.exp %167 : vector<2x128xf32>
    %cst_38 = arith.constant 1.000000e+00 : f32
    %169 = vector.broadcast %cst_38 : f32 to vector<2x128xf32>
    %170 = arith.addf %169, %168 : vector<2x128xf32>
    %171 = arith.divf %169, %170 : vector<2x128xf32>
    %172 = math.tanh %166 : vector<2x128xf32>
    %173 = vector.extract_strided_slice %171 {offsets = [0, 0], sizes = [2, 32], strides = [1, 1]} : vector<2x128xf32> to vector<2x32xf32>
    %174 = vector.extract_strided_slice %171 {offsets = [0, 32], sizes = [2, 32], strides = [1, 1]} : vector<2x128xf32> to vector<2x32xf32>
    %175 = vector.extract_strided_slice %172 {offsets = [0, 64], sizes = [2, 32], strides = [1, 1]} : vector<2x128xf32> to vector<2x32xf32>
    %176 = vector.extract_strided_slice %171 {offsets = [0, 96], sizes = [2, 32], strides = [1, 1]} : vector<2x128xf32> to vector<2x32xf32>
    %177 = arith.mulf %174, %150 : vector<2x32xf32>
    %178 = arith.mulf %173, %175 : vector<2x32xf32>
    %179 = arith.addf %177, %178 : vector<2x32xf32>
    %180 = math.tanh %179 : vector<2x32xf32>
    %181 = arith.mulf %176, %180 : vector<2x32xf32>
    %c0_39 = arith.constant 0 : index
    %c0_40 = arith.constant 0 : index
    %182 = vector.load %arg10[%c0_39, %c0_40] : memref<30x32xf32, #tpu.memory_space<vmem>>, vector<2x32xf32>
    tpu.vector_store %arg10[%c0_39, %c0_40], %181 {strides = array<i32>} : memref<30x32xf32, #tpu.memory_space<vmem>>, vector<2x32xf32>,
    %cst_41 = arith.constant dense<0.000000e+00> : vector<2x128xf32>
    %183 = tpu.matmul %181, %159, %cst_41 {dimension_numbers = #tpu.dot_dimension_numbers<[1], [0], [0], [1], [0, 0, 1, 1], [], []>} : vector<2x32xf32>, vector<32x128xf32>, vector<2x128xf32> -> vector<2x128xf32>
    %184 = arith.addf %183, %163 : vector<2x128xf32>
    %185 = arith.negf %184 : vector<2x128xf32>
    %186 = math.exp %185 : vector<2x128xf32>
    %cst_42 = arith.constant 1.000000e+00 : f32
    %187 = vector.broadcast %cst_42 : f32 to vector<2x128xf32>
    %188 = arith.addf %187, %186 : vector<2x128xf32>
    %189 = arith.divf %187, %188 : vector<2x128xf32>
    %190 = math.tanh %184 : vector<2x128xf32>
    %191 = vector.extract_strided_slice %189 {offsets = [0, 0], sizes = [2, 32], strides = [1, 1]} : vector<2x128xf32> to vector<2x32xf32>
    %192 = vector.extract_strided_slice %189 {offsets = [0, 32], sizes = [2, 32], strides = [1, 1]} : vector<2x128xf32> to vector<2x32xf32>
    %193 = vector.extract_strided_slice %190 {offsets = [0, 64], sizes = [2, 32], strides = [1, 1]} : vector<2x128xf32> to vector<2x32xf32>
    %194 = vector.extract_strided_slice %189 {offsets = [0, 96], sizes = [2, 32], strides = [1, 1]} : vector<2x128xf32> to vector<2x32xf32>
    %195 = arith.mulf %192, %179 : vector<2x32xf32>
    %196 = arith.mulf %191, %193 : vector<2x32xf32>
    %197 = arith.addf %195, %196 : vector<2x32xf32>
    %198 = math.tanh %197 : vector<2x32xf32>
    %199 = arith.mulf %194, %198 : vector<2x32xf32>
    %c2 = arith.constant 2 : index
    %c0_43 = arith.constant 0 : index
    %200 = vector.load %arg10[%c2, %c0_43] : memref<30x32xf32, #tpu.memory_space<vmem>>, vector<2x32xf32>
    tpu.vector_store %arg10[%c2, %c0_43], %199 {strides = array<i32>} : memref<30x32xf32, #tpu.memory_space<vmem>>, vector<2x32xf32>,
    %cst_44 = arith.constant dense<0.000000e+00> : vector<2x128xf32>
    %201 = tpu.matmul %199, %159, %cst_44 {dimension_numbers = #tpu.dot_dimension_numbers<[1], [0], [0], [1], [0, 0, 1, 1], [], []>} : vector<2x32xf32>, vector<32x128xf32>, vector<2x128xf32> -> vector<2x128xf32>
    %202 = arith.addf %201, %163 : vector<2x128xf32>
    %203 = arith.negf %202 : vector<2x128xf32>
    %204 = math.exp %203 : vector<2x128xf32>
    %cst_45 = arith.constant 1.000000e+00 : f32
    %205 = vector.broadcast %cst_45 : f32 to vector<2x128xf32>
    %206 = arith.addf %205, %204 : vector<2x128xf32>
    %207 = arith.divf %205, %206 : vector<2x128xf32>
    %208 = math.tanh %202 : vector<2x128xf32>
    %209 = vector.extract_strided_slice %207 {offsets = [0, 0], sizes = [2, 32], strides = [1, 1]} : vector<2x128xf32> to vector<2x32xf32>
    %210 = vector.extract_strided_slice %207 {offsets = [0, 32], sizes = [2, 32], strides = [1, 1]} : vector<2x128xf32> to vector<2x32xf32>
    %211 = vector.extract_strided_slice %208 {offsets = [0, 64], sizes = [2, 32], strides = [1, 1]} : vector<2x128xf32> to vector<2x32xf32>
    %212 = vector.extract_strided_slice %207 {offsets = [0, 96], sizes = [2, 32], strides = [1, 1]} : vector<2x128xf32> to vector<2x32xf32>
    %213 = arith.mulf %210, %197 : vector<2x32xf32>
    %214 = arith.mulf %209, %211 : vector<2x32xf32>
    %215 = arith.addf %213, %214 : vector<2x32xf32>
    %216 = math.tanh %215 : vector<2x32xf32>
    %217 = arith.mulf %212, %216 : vector<2x32xf32>
    %c4 = arith.constant 4 : index
    %c0_46 = arith.constant 0 : index
    %218 = vector.load %arg10[%c4, %c0_46] : memref<30x32xf32, #tpu.memory_space<vmem>>, vector<2x32xf32>
    tpu.vector_store %arg10[%c4, %c0_46], %217 {strides = array<i32>} : memref<30x32xf32, #tpu.memory_space<vmem>>, vector<2x32xf32>,
    %cst_47 = arith.constant dense<0.000000e+00> : vector<2x128xf32>
    %219 = tpu.matmul %217, %159, %cst_47 {dimension_numbers = #tpu.dot_dimension_numbers<[1], [0], [0], [1], [0, 0, 1, 1], [], []>} : vector<2x32xf32>, vector<32x128xf32>, vector<2x128xf32> -> vector<2x128xf32>
    %220 = arith.addf %219, %163 : vector<2x128xf32>
    %221 = arith.negf %220 : vector<2x128xf32>
    %222 = math.exp %221 : vector<2x128xf32>
    %cst_48 = arith.constant 1.000000e+00 : f32
    %223 = vector.broadcast %cst_48 : f32 to vector<2x128xf32>
    %224 = arith.addf %223, %222 : vector<2x128xf32>
    %225 = arith.divf %223, %224 : vector<2x128xf32>
    %226 = math.tanh %220 : vector<2x128xf32>
    %227 = vector.extract_strided_slice %225 {offsets = [0, 0], sizes = [2, 32], strides = [1, 1]} : vector<2x128xf32> to vector<2x32xf32>
    %228 = vector.extract_strided_slice %225 {offsets = [0, 32], sizes = [2, 32], strides = [1, 1]} : vector<2x128xf32> to vector<2x32xf32>
    %229 = vector.extract_strided_slice %226 {offsets = [0, 64], sizes = [2, 32], strides = [1, 1]} : vector<2x128xf32> to vector<2x32xf32>
    %230 = vector.extract_strided_slice %225 {offsets = [0, 96], sizes = [2, 32], strides = [1, 1]} : vector<2x128xf32> to vector<2x32xf32>
    %231 = arith.mulf %228, %215 : vector<2x32xf32>
    %232 = arith.mulf %227, %229 : vector<2x32xf32>
    %233 = arith.addf %231, %232 : vector<2x32xf32>
    %234 = math.tanh %233 : vector<2x32xf32>
    %235 = arith.mulf %230, %234 : vector<2x32xf32>
    %c6 = arith.constant 6 : index
    %c0_49 = arith.constant 0 : index
    %236 = vector.load %arg10[%c6, %c0_49] : memref<30x32xf32, #tpu.memory_space<vmem>>, vector<2x32xf32>
    tpu.vector_store %arg10[%c6, %c0_49], %235 {strides = array<i32>} : memref<30x32xf32, #tpu.memory_space<vmem>>, vector<2x32xf32>,
    %cst_50 = arith.constant dense<0.000000e+00> : vector<2x128xf32>
    %237 = tpu.matmul %235, %159, %cst_50 {dimension_numbers = #tpu.dot_dimension_numbers<[1], [0], [0], [1], [0, 0, 1, 1], [], []>} : vector<2x32xf32>, vector<32x128xf32>, vector<2x128xf32> -> vector<2x128xf32>
    %238 = arith.addf %237, %163 : vector<2x128xf32>
    %239 = arith.negf %238 : vector<2x128xf32>
    %240 = math.exp %239 : vector<2x128xf32>
    %cst_51 = arith.constant 1.000000e+00 : f32
    %241 = vector.broadcast %cst_51 : f32 to vector<2x128xf32>
    %242 = arith.addf %241, %240 : vector<2x128xf32>
    %243 = arith.divf %241, %242 : vector<2x128xf32>
    %244 = math.tanh %238 : vector<2x128xf32>
    %245 = vector.extract_strided_slice %243 {offsets = [0, 0], sizes = [2, 32], strides = [1, 1]} : vector<2x128xf32> to vector<2x32xf32>
    %246 = vector.extract_strided_slice %243 {offsets = [0, 32], sizes = [2, 32], strides = [1, 1]} : vector<2x128xf32> to vector<2x32xf32>
    %247 = vector.extract_strided_slice %244 {offsets = [0, 64], sizes = [2, 32], strides = [1, 1]} : vector<2x128xf32> to vector<2x32xf32>
    %248 = vector.extract_strided_slice %243 {offsets = [0, 96], sizes = [2, 32], strides = [1, 1]} : vector<2x128xf32> to vector<2x32xf32>
    %249 = arith.mulf %246, %233 : vector<2x32xf32>
    %250 = arith.mulf %245, %247 : vector<2x32xf32>
    %251 = arith.addf %249, %250 : vector<2x32xf32>
    %252 = math.tanh %251 : vector<2x32xf32>
    %253 = arith.mulf %248, %252 : vector<2x32xf32>
    %c8 = arith.constant 8 : index
    %c0_52 = arith.constant 0 : index
    %254 = vector.load %arg10[%c8, %c0_52] : memref<30x32xf32, #tpu.memory_space<vmem>>, vector<2x32xf32>
    tpu.vector_store %arg10[%c8, %c0_52], %253 {strides = array<i32>} : memref<30x32xf32, #tpu.memory_space<vmem>>, vector<2x32xf32>,
    %cst_53 = arith.constant dense<0.000000e+00> : vector<2x128xf32>
    %255 = tpu.matmul %253, %159, %cst_53 {dimension_numbers = #tpu.dot_dimension_numbers<[1], [0], [0], [1], [0, 0, 1, 1], [], []>} : vector<2x32xf32>, vector<32x128xf32>, vector<2x128xf32> -> vector<2x128xf32>
    %256 = arith.addf %255, %163 : vector<2x128xf32>
    %257 = arith.negf %256 : vector<2x128xf32>
    %258 = math.exp %257 : vector<2x128xf32>
    %cst_54 = arith.constant 1.000000e+00 : f32
    %259 = vector.broadcast %cst_54 : f32 to vector<2x128xf32>
    %260 = arith.addf %259, %258 : vector<2x128xf32>
    %261 = arith.divf %259, %260 : vector<2x128xf32>
    %262 = math.tanh %256 : vector<2x128xf32>
    %263 = vector.extract_strided_slice %261 {offsets = [0, 0], sizes = [2, 32], strides = [1, 1]} : vector<2x128xf32> to vector<2x32xf32>
    %264 = vector.extract_strided_slice %261 {offsets = [0, 32], sizes = [2, 32], strides = [1, 1]} : vector<2x128xf32> to vector<2x32xf32>
    %265 = vector.extract_strided_slice %262 {offsets = [0, 64], sizes = [2, 32], strides = [1, 1]} : vector<2x128xf32> to vector<2x32xf32>
    %266 = vector.extract_strided_slice %261 {offsets = [0, 96], sizes = [2, 32], strides = [1, 1]} : vector<2x128xf32> to vector<2x32xf32>
    %267 = arith.mulf %264, %251 : vector<2x32xf32>
    %268 = arith.mulf %263, %265 : vector<2x32xf32>
    %269 = arith.addf %267, %268 : vector<2x32xf32>
    %270 = math.tanh %269 : vector<2x32xf32>
    %271 = arith.mulf %266, %270 : vector<2x32xf32>
    %c10 = arith.constant 10 : index
    %c0_55 = arith.constant 0 : index
    %272 = vector.load %arg10[%c10, %c0_55] : memref<30x32xf32, #tpu.memory_space<vmem>>, vector<2x32xf32>
    tpu.vector_store %arg10[%c10, %c0_55], %271 {strides = array<i32>} : memref<30x32xf32, #tpu.memory_space<vmem>>, vector<2x32xf32>,
    %cst_56 = arith.constant dense<0.000000e+00> : vector<2x128xf32>
    %273 = tpu.matmul %271, %159, %cst_56 {dimension_numbers = #tpu.dot_dimension_numbers<[1], [0], [0], [1], [0, 0, 1, 1], [], []>} : vector<2x32xf32>, vector<32x128xf32>, vector<2x128xf32> -> vector<2x128xf32>
    %274 = arith.addf %273, %163 : vector<2x128xf32>
    %275 = arith.negf %274 : vector<2x128xf32>
    %276 = math.exp %275 : vector<2x128xf32>
    %cst_57 = arith.constant 1.000000e+00 : f32
    %277 = vector.broadcast %cst_57 : f32 to vector<2x128xf32>
    %278 = arith.addf %277, %276 : vector<2x128xf32>
    %279 = arith.divf %277, %278 : vector<2x128xf32>
    %280 = math.tanh %274 : vector<2x128xf32>
    %281 = vector.extract_strided_slice %279 {offsets = [0, 0], sizes = [2, 32], strides = [1, 1]} : vector<2x128xf32> to vector<2x32xf32>
    %282 = vector.extract_strided_slice %279 {offsets = [0, 32], sizes = [2, 32], strides = [1, 1]} : vector<2x128xf32> to vector<2x32xf32>
    %283 = vector.extract_strided_slice %280 {offsets = [0, 64], sizes = [2, 32], strides = [1, 1]} : vector<2x128xf32> to vector<2x32xf32>
    %284 = vector.extract_strided_slice %279 {offsets = [0, 96], sizes = [2, 32], strides = [1, 1]} : vector<2x128xf32> to vector<2x32xf32>
    %285 = arith.mulf %282, %269 : vector<2x32xf32>
    %286 = arith.mulf %281, %283 : vector<2x32xf32>
    %287 = arith.addf %285, %286 : vector<2x32xf32>
    %288 = math.tanh %287 : vector<2x32xf32>
    %289 = arith.mulf %284, %288 : vector<2x32xf32>
    %c12 = arith.constant 12 : index
    %c0_58 = arith.constant 0 : index
    %290 = vector.load %arg10[%c12, %c0_58] : memref<30x32xf32, #tpu.memory_space<vmem>>, vector<2x32xf32>
    tpu.vector_store %arg10[%c12, %c0_58], %289 {strides = array<i32>} : memref<30x32xf32, #tpu.memory_space<vmem>>, vector<2x32xf32>,
    %cst_59 = arith.constant dense<0.000000e+00> : vector<2x128xf32>
    %291 = tpu.matmul %289, %159, %cst_59 {dimension_numbers = #tpu.dot_dimension_numbers<[1], [0], [0], [1], [0, 0, 1, 1], [], []>} : vector<2x32xf32>, vector<32x128xf32>, vector<2x128xf32> -> vector<2x128xf32>
    %292 = arith.addf %291, %163 : vector<2x128xf32>
    %293 = arith.negf %292 : vector<2x128xf32>
    %294 = math.exp %293 : vector<2x128xf32>
    %cst_60 = arith.constant 1.000000e+00 : f32
    %295 = vector.broadcast %cst_60 : f32 to vector<2x128xf32>
    %296 = arith.addf %295, %294 : vector<2x128xf32>
    %297 = arith.divf %295, %296 : vector<2x128xf32>
    %298 = math.tanh %292 : vector<2x128xf32>
    %299 = vector.extract_strided_slice %297 {offsets = [0, 0], sizes = [2, 32], strides = [1, 1]} : vector<2x128xf32> to vector<2x32xf32>
    %300 = vector.extract_strided_slice %297 {offsets = [0, 32], sizes = [2, 32], strides = [1, 1]} : vector<2x128xf32> to vector<2x32xf32>
    %301 = vector.extract_strided_slice %298 {offsets = [0, 64], sizes = [2, 32], strides = [1, 1]} : vector<2x128xf32> to vector<2x32xf32>
    %302 = vector.extract_strided_slice %297 {offsets = [0, 96], sizes = [2, 32], strides = [1, 1]} : vector<2x128xf32> to vector<2x32xf32>
    %303 = arith.mulf %300, %287 : vector<2x32xf32>
    %304 = arith.mulf %299, %301 : vector<2x32xf32>
    %305 = arith.addf %303, %304 : vector<2x32xf32>
    %306 = math.tanh %305 : vector<2x32xf32>
    %307 = arith.mulf %302, %306 : vector<2x32xf32>
    %c14 = arith.constant 14 : index
    %c0_61 = arith.constant 0 : index
    %308 = vector.load %arg10[%c14, %c0_61] : memref<30x32xf32, #tpu.memory_space<vmem>>, vector<2x32xf32>
    tpu.vector_store %arg10[%c14, %c0_61], %307 {strides = array<i32>} : memref<30x32xf32, #tpu.memory_space<vmem>>, vector<2x32xf32>,
    %cst_62 = arith.constant dense<0.000000e+00> : vector<2x128xf32>
    %309 = tpu.matmul %307, %159, %cst_62 {dimension_numbers = #tpu.dot_dimension_numbers<[1], [0], [0], [1], [0, 0, 1, 1], [], []>} : vector<2x32xf32>, vector<32x128xf32>, vector<2x128xf32> -> vector<2x128xf32>
    %310 = arith.addf %309, %163 : vector<2x128xf32>
    %311 = arith.negf %310 : vector<2x128xf32>
    %312 = math.exp %311 : vector<2x128xf32>
    %cst_63 = arith.constant 1.000000e+00 : f32
    %313 = vector.broadcast %cst_63 : f32 to vector<2x128xf32>
    %314 = arith.addf %313, %312 : vector<2x128xf32>
    %315 = arith.divf %313, %314 : vector<2x128xf32>
    %316 = math.tanh %310 : vector<2x128xf32>
    %317 = vector.extract_strided_slice %315 {offsets = [0, 0], sizes = [2, 32], strides = [1, 1]} : vector<2x128xf32> to vector<2x32xf32>
    %318 = vector.extract_strided_slice %315 {offsets = [0, 32], sizes = [2, 32], strides = [1, 1]} : vector<2x128xf32> to vector<2x32xf32>
    %319 = vector.extract_strided_slice %316 {offsets = [0, 64], sizes = [2, 32], strides = [1, 1]} : vector<2x128xf32> to vector<2x32xf32>
    %320 = vector.extract_strided_slice %315 {offsets = [0, 96], sizes = [2, 32], strides = [1, 1]} : vector<2x128xf32> to vector<2x32xf32>
    %321 = arith.mulf %318, %305 : vector<2x32xf32>
    %322 = arith.mulf %317, %319 : vector<2x32xf32>
    %323 = arith.addf %321, %322 : vector<2x32xf32>
    %324 = math.tanh %323 : vector<2x32xf32>
    %325 = arith.mulf %320, %324 : vector<2x32xf32>
    %c16 = arith.constant 16 : index
    %c0_64 = arith.constant 0 : index
    %326 = vector.load %arg10[%c16, %c0_64] : memref<30x32xf32, #tpu.memory_space<vmem>>, vector<2x32xf32>
    tpu.vector_store %arg10[%c16, %c0_64], %325 {strides = array<i32>} : memref<30x32xf32, #tpu.memory_space<vmem>>, vector<2x32xf32>,
    %cst_65 = arith.constant dense<0.000000e+00> : vector<2x128xf32>
    %327 = tpu.matmul %325, %159, %cst_65 {dimension_numbers = #tpu.dot_dimension_numbers<[1], [0], [0], [1], [0, 0, 1, 1], [], []>} : vector<2x32xf32>, vector<32x128xf32>, vector<2x128xf32> -> vector<2x128xf32>
    %328 = arith.addf %327, %163 : vector<2x128xf32>
    %329 = arith.negf %328 : vector<2x128xf32>
    %330 = math.exp %329 : vector<2x128xf32>
    %cst_66 = arith.constant 1.000000e+00 : f32
    %331 = vector.broadcast %cst_66 : f32 to vector<2x128xf32>
    %332 = arith.addf %331, %330 : vector<2x128xf32>
    %333 = arith.divf %331, %332 : vector<2x128xf32>
    %334 = math.tanh %328 : vector<2x128xf32>
    %335 = vector.extract_strided_slice %333 {offsets = [0, 0], sizes = [2, 32], strides = [1, 1]} : vector<2x128xf32> to vector<2x32xf32>
    %336 = vector.extract_strided_slice %333 {offsets = [0, 32], sizes = [2, 32], strides = [1, 1]} : vector<2x128xf32> to vector<2x32xf32>
    %337 = vector.extract_strided_slice %334 {offsets = [0, 64], sizes = [2, 32], strides = [1, 1]} : vector<2x128xf32> to vector<2x32xf32>
    %338 = vector.extract_strided_slice %333 {offsets = [0, 96], sizes = [2, 32], strides = [1, 1]} : vector<2x128xf32> to vector<2x32xf32>
    %339 = arith.mulf %336, %323 : vector<2x32xf32>
    %340 = arith.mulf %335, %337 : vector<2x32xf32>
    %341 = arith.addf %339, %340 : vector<2x32xf32>
    %342 = math.tanh %341 : vector<2x32xf32>
    %343 = arith.mulf %338, %342 : vector<2x32xf32>
    %c18 = arith.constant 18 : index
    %c0_67 = arith.constant 0 : index
    %344 = vector.load %arg10[%c18, %c0_67] : memref<30x32xf32, #tpu.memory_space<vmem>>, vector<2x32xf32>
    tpu.vector_store %arg10[%c18, %c0_67], %343 {strides = array<i32>} : memref<30x32xf32, #tpu.memory_space<vmem>>, vector<2x32xf32>,
    %cst_68 = arith.constant dense<0.000000e+00> : vector<2x128xf32>
    %345 = tpu.matmul %343, %159, %cst_68 {dimension_numbers = #tpu.dot_dimension_numbers<[1], [0], [0], [1], [0, 0, 1, 1], [], []>} : vector<2x32xf32>, vector<32x128xf32>, vector<2x128xf32> -> vector<2x128xf32>
    %346 = arith.addf %345, %163 : vector<2x128xf32>
    %347 = arith.negf %346 : vector<2x128xf32>
    %348 = math.exp %347 : vector<2x128xf32>
    %cst_69 = arith.constant 1.000000e+00 : f32
    %349 = vector.broadcast %cst_69 : f32 to vector<2x128xf32>
    %350 = arith.addf %349, %348 : vector<2x128xf32>
    %351 = arith.divf %349, %350 : vector<2x128xf32>
    %352 = math.tanh %346 : vector<2x128xf32>
    %353 = vector.extract_strided_slice %351 {offsets = [0, 0], sizes = [2, 32], strides = [1, 1]} : vector<2x128xf32> to vector<2x32xf32>
    %354 = vector.extract_strided_slice %351 {offsets = [0, 32], sizes = [2, 32], strides = [1, 1]} : vector<2x128xf32> to vector<2x32xf32>
    %355 = vector.extract_strided_slice %352 {offsets = [0, 64], sizes = [2, 32], strides = [1, 1]} : vector<2x128xf32> to vector<2x32xf32>
    %356 = vector.extract_strided_slice %351 {offsets = [0, 96], sizes = [2, 32], strides = [1, 1]} : vector<2x128xf32> to vector<2x32xf32>
    %357 = arith.mulf %354, %341 : vector<2x32xf32>
    %358 = arith.mulf %353, %355 : vector<2x32xf32>
    %359 = arith.addf %357, %358 : vector<2x32xf32>
    %360 = math.tanh %359 : vector<2x32xf32>
    %361 = arith.mulf %356, %360 : vector<2x32xf32>
    %c20 = arith.constant 20 : index
    %c0_70 = arith.constant 0 : index
    %362 = vector.load %arg10[%c20, %c0_70] : memref<30x32xf32, #tpu.memory_space<vmem>>, vector<2x32xf32>
    tpu.vector_store %arg10[%c20, %c0_70], %361 {strides = array<i32>} : memref<30x32xf32, #tpu.memory_space<vmem>>, vector<2x32xf32>,
    %cst_71 = arith.constant dense<0.000000e+00> : vector<2x128xf32>
    %363 = tpu.matmul %361, %159, %cst_71 {dimension_numbers = #tpu.dot_dimension_numbers<[1], [0], [0], [1], [0, 0, 1, 1], [], []>} : vector<2x32xf32>, vector<32x128xf32>, vector<2x128xf32> -> vector<2x128xf32>
    %364 = arith.addf %363, %163 : vector<2x128xf32>
    %365 = arith.negf %364 : vector<2x128xf32>
    %366 = math.exp %365 : vector<2x128xf32>
    %cst_72 = arith.constant 1.000000e+00 : f32
    %367 = vector.broadcast %cst_72 : f32 to vector<2x128xf32>
    %368 = arith.addf %367, %366 : vector<2x128xf32>
    %369 = arith.divf %367, %368 : vector<2x128xf32>
    %370 = math.tanh %364 : vector<2x128xf32>
    %371 = vector.extract_strided_slice %369 {offsets = [0, 0], sizes = [2, 32], strides = [1, 1]} : vector<2x128xf32> to vector<2x32xf32>
    %372 = vector.extract_strided_slice %369 {offsets = [0, 32], sizes = [2, 32], strides = [1, 1]} : vector<2x128xf32> to vector<2x32xf32>
    %373 = vector.extract_strided_slice %370 {offsets = [0, 64], sizes = [2, 32], strides = [1, 1]} : vector<2x128xf32> to vector<2x32xf32>
    %374 = vector.extract_strided_slice %369 {offsets = [0, 96], sizes = [2, 32], strides = [1, 1]} : vector<2x128xf32> to vector<2x32xf32>
    %375 = arith.mulf %372, %359 : vector<2x32xf32>
    %376 = arith.mulf %371, %373 : vector<2x32xf32>
    %377 = arith.addf %375, %376 : vector<2x32xf32>
    %378 = math.tanh %377 : vector<2x32xf32>
    %379 = arith.mulf %374, %378 : vector<2x32xf32>
    %c22 = arith.constant 22 : index
    %c0_73 = arith.constant 0 : index
    %380 = vector.load %arg10[%c22, %c0_73] : memref<30x32xf32, #tpu.memory_space<vmem>>, vector<2x32xf32>
    tpu.vector_store %arg10[%c22, %c0_73], %379 {strides = array<i32>} : memref<30x32xf32, #tpu.memory_space<vmem>>, vector<2x32xf32>,
    %cst_74 = arith.constant dense<0.000000e+00> : vector<2x128xf32>
    %381 = tpu.matmul %379, %159, %cst_74 {dimension_numbers = #tpu.dot_dimension_numbers<[1], [0], [0], [1], [0, 0, 1, 1], [], []>} : vector<2x32xf32>, vector<32x128xf32>, vector<2x128xf32> -> vector<2x128xf32>
    %382 = arith.addf %381, %163 : vector<2x128xf32>
    %383 = arith.negf %382 : vector<2x128xf32>
    %384 = math.exp %383 : vector<2x128xf32>
    %cst_75 = arith.constant 1.000000e+00 : f32
    %385 = vector.broadcast %cst_75 : f32 to vector<2x128xf32>
    %386 = arith.addf %385, %384 : vector<2x128xf32>
    %387 = arith.divf %385, %386 : vector<2x128xf32>
    %388 = math.tanh %382 : vector<2x128xf32>
    %389 = vector.extract_strided_slice %387 {offsets = [0, 0], sizes = [2, 32], strides = [1, 1]} : vector<2x128xf32> to vector<2x32xf32>
    %390 = vector.extract_strided_slice %387 {offsets = [0, 32], sizes = [2, 32], strides = [1, 1]} : vector<2x128xf32> to vector<2x32xf32>
    %391 = vector.extract_strided_slice %388 {offsets = [0, 64], sizes = [2, 32], strides = [1, 1]} : vector<2x128xf32> to vector<2x32xf32>
    %392 = vector.extract_strided_slice %387 {offsets = [0, 96], sizes = [2, 32], strides = [1, 1]} : vector<2x128xf32> to vector<2x32xf32>
    %393 = arith.mulf %390, %377 : vector<2x32xf32>
    %394 = arith.mulf %389, %391 : vector<2x32xf32>
    %395 = arith.addf %393, %394 : vector<2x32xf32>
    %396 = math.tanh %395 : vector<2x32xf32>
    %397 = arith.mulf %392, %396 : vector<2x32xf32>
    %c24 = arith.constant 24 : index
    %c0_76 = arith.constant 0 : index
    %398 = vector.load %arg10[%c24, %c0_76] : memref<30x32xf32, #tpu.memory_space<vmem>>, vector<2x32xf32>
    tpu.vector_store %arg10[%c24, %c0_76], %397 {strides = array<i32>} : memref<30x32xf32, #tpu.memory_space<vmem>>, vector<2x32xf32>,
    %cst_77 = arith.constant dense<0.000000e+00> : vector<2x128xf32>
    %399 = tpu.matmul %397, %159, %cst_77 {dimension_numbers = #tpu.dot_dimension_numbers<[1], [0], [0], [1], [0, 0, 1, 1], [], []>} : vector<2x32xf32>, vector<32x128xf32>, vector<2x128xf32> -> vector<2x128xf32>
    %400 = arith.addf %399, %163 : vector<2x128xf32>
    %401 = arith.negf %400 : vector<2x128xf32>
    %402 = math.exp %401 : vector<2x128xf32>
    %cst_78 = arith.constant 1.000000e+00 : f32
    %403 = vector.broadcast %cst_78 : f32 to vector<2x128xf32>
    %404 = arith.addf %403, %402 : vector<2x128xf32>
    %405 = arith.divf %403, %404 : vector<2x128xf32>
    %406 = math.tanh %400 : vector<2x128xf32>
    %407 = vector.extract_strided_slice %405 {offsets = [0, 0], sizes = [2, 32], strides = [1, 1]} : vector<2x128xf32> to vector<2x32xf32>
    %408 = vector.extract_strided_slice %405 {offsets = [0, 32], sizes = [2, 32], strides = [1, 1]} : vector<2x128xf32> to vector<2x32xf32>
    %409 = vector.extract_strided_slice %406 {offsets = [0, 64], sizes = [2, 32], strides = [1, 1]} : vector<2x128xf32> to vector<2x32xf32>
    %410 = vector.extract_strided_slice %405 {offsets = [0, 96], sizes = [2, 32], strides = [1, 1]} : vector<2x128xf32> to vector<2x32xf32>
    %411 = arith.mulf %408, %395 : vector<2x32xf32>
    %412 = arith.mulf %407, %409 : vector<2x32xf32>
    %413 = arith.addf %411, %412 : vector<2x32xf32>
    %414 = math.tanh %413 : vector<2x32xf32>
    %415 = arith.mulf %410, %414 : vector<2x32xf32>
    %c26 = arith.constant 26 : index
    %c0_79 = arith.constant 0 : index
    %416 = vector.load %arg10[%c26, %c0_79] : memref<30x32xf32, #tpu.memory_space<vmem>>, vector<2x32xf32>
    tpu.vector_store %arg10[%c26, %c0_79], %415 {strides = array<i32>} : memref<30x32xf32, #tpu.memory_space<vmem>>, vector<2x32xf32>,
    %cst_80 = arith.constant dense<0.000000e+00> : vector<2x128xf32>
    %417 = tpu.matmul %415, %159, %cst_80 {dimension_numbers = #tpu.dot_dimension_numbers<[1], [0], [0], [1], [0, 0, 1, 1], [], []>} : vector<2x32xf32>, vector<32x128xf32>, vector<2x128xf32> -> vector<2x128xf32>
    %418 = arith.addf %417, %163 : vector<2x128xf32>
    %419 = arith.negf %418 : vector<2x128xf32>
    %420 = math.exp %419 : vector<2x128xf32>
    %cst_81 = arith.constant 1.000000e+00 : f32
    %421 = vector.broadcast %cst_81 : f32 to vector<2x128xf32>
    %422 = arith.addf %421, %420 : vector<2x128xf32>
    %423 = arith.divf %421, %422 : vector<2x128xf32>
    %424 = math.tanh %418 : vector<2x128xf32>
    %425 = vector.extract_strided_slice %423 {offsets = [0, 0], sizes = [2, 32], strides = [1, 1]} : vector<2x128xf32> to vector<2x32xf32>
    %426 = vector.extract_strided_slice %423 {offsets = [0, 32], sizes = [2, 32], strides = [1, 1]} : vector<2x128xf32> to vector<2x32xf32>
    %427 = vector.extract_strided_slice %424 {offsets = [0, 64], sizes = [2, 32], strides = [1, 1]} : vector<2x128xf32> to vector<2x32xf32>
    %428 = vector.extract_strided_slice %423 {offsets = [0, 96], sizes = [2, 32], strides = [1, 1]} : vector<2x128xf32> to vector<2x32xf32>
    %429 = arith.mulf %426, %413 : vector<2x32xf32>
    %430 = arith.mulf %425, %427 : vector<2x32xf32>
    %431 = arith.addf %429, %430 : vector<2x32xf32>
    %432 = math.tanh %431 : vector<2x32xf32>
    %433 = arith.mulf %428, %432 : vector<2x32xf32>
    %c28 = arith.constant 28 : index
    %c0_82 = arith.constant 0 : index
    %434 = vector.load %arg10[%c28, %c0_82] : memref<30x32xf32, #tpu.memory_space<vmem>>, vector<2x32xf32>
    tpu.vector_store %arg10[%c28, %c0_82], %433 {strides = array<i32>} : memref<30x32xf32, #tpu.memory_space<vmem>>, vector<2x32xf32>,
    %cst_83 = arith.constant 0.000000e+00 : f32
    %435 = vector.broadcast %cst_83 : f32 to vector<2x8xf32>
    %c0_84 = arith.constant 0 : index
    %c0_85 = arith.constant 0 : index
    %436 = vector.load %arg9[%c0_84, %c0_85] : memref<32x8xf32, #tpu.memory_space<vmem>>, vector<2x8xf32>
    tpu.vector_store %arg9[%c0_84, %c0_85], %435 {strides = array<i32>} : memref<32x8xf32, #tpu.memory_space<vmem>>, vector<2x8xf32>,
    %c0_86 = arith.constant 0 : index
    %c0_87 = arith.constant 0 : index
    %437 = vector.load %arg10[%c0_86, %c0_87] : memref<30x32xf32, #tpu.memory_space<vmem>>, vector<30x32xf32>
    %cst_88 = arith.constant dense<0.000000e+00> : vector<30x8xf32>
    %438 = tpu.matmul %437, %156, %cst_88 {dimension_numbers = #tpu.dot_dimension_numbers<[1], [0], [0], [1], [0, 0, 1, 1], [], []>} : vector<30x32xf32>, vector<32x8xf32>, vector<30x8xf32> -> vector<30x8xf32>
    %439 = vector.broadcast %157 : vector<1x8xf32> to vector<30x8xf32>
    %440 = arith.addf %438, %439 : vector<30x8xf32>
    %c2_89 = arith.constant 2 : index
    %c0_90 = arith.constant 0 : index
    %441 = vector.load %arg9[%c2_89, %c0_90] : memref<32x8xf32, #tpu.memory_space<vmem>>, vector<30x8xf32>
    tpu.vector_store %arg9[%c2_89, %c0_90], %440 {strides = array<i32>} : memref<32x8xf32, #tpu.memory_space<vmem>>, vector<30x8xf32>,
    return
  }
}

</mosaic_0001>

<bundles_post_ra>
// kernel: seq2seq_forward.1
= control target key start
LH: loop header
LB: loop body
LE: loop exit
PB: predicated region body
PF: predicated region fallthrough
CT: control target
= control target key end

     0   :  { %vm46_vm0 = vcmask 64512   ;;  %v3619_v3 = vmov 0.0|0.0   ;;  %vm3620_vm1 = vmmov 0   ;;  %v3621_v4 = vmov 0.0   ;;  %s3622_s22 = smov 64   ;;  %s4095_s1 = inlined_call_operand.vmem [shape: f32[8,128], index: 1, kind: input, shape index: {}]   ;;  %s4096_s0 = inlined_call_operand.vmem [shape: f32[16,8], index: 0, kind: input, shape index: {}]   ;;  %s4097_s2 = inlined_call_operand.vmem [shape: f32[32,128], index: 2, kind: input, shape index: {}]   ;;  %s4098_s3 = inlined_call_operand.vmem [shape: f32[1,128], index: 3, kind: input, shape index: {}]   ;;  %s4099_s4 = inlined_call_operand.vmem [shape: f32[8,128], index: 4, kind: input, shape index: {}]   ;;  %s4100_s7 = inlined_call_operand.vmem [shape: f32[32,8], index: 7, kind: input, shape index: {}]   ;;  %s4101_s5 = inlined_call_operand.vmem [shape: f32[32,128], index: 5, kind: input, shape index: {}]   ;;  %s4102_s8 = inlined_call_operand.vmem [shape: f32[1,8], index: 8, kind: input, shape index: {}]   ;;  %s4103_s6 = inlined_call_operand.vmem [shape: f32[1,128], index: 6, kind: input, shape index: {}]   ;;  %s4104_s9 = inlined_call_operand.vmem [shape: f32[32,8], index: 9, kind: output, shape index: {}]  }
   0x1   :  { %v38_v0 = vld [vmem:[%s4095_s1] sm:$0xff]  ;;  %v37_v2 = vld [vmem:[%s4096_s0 + $0x8] sm:$0xff]  ;;  %3290 = vmatprep.subr.bf16.mxu0 %v3619_v3  ;;  %3023 = vmatprep.mubr.msk.f32.mxu0 %vm3620_vm1, %v3621_v4  ;;  %v34_v7 = vld [vmem:[%s4097_s2 + $0x10] sm:$0xff]  ;;  %vm128_vm2 = vcmask 261120   ;;  %vm1276_vm3 = vcmask 254976   ;;  %vm2692_vm4 = vcmask 58368  }
   0x2   :  { %v36_v1 = vld [vmem:[%s4096_s0] sm:$0xff]  ;;  %2999 = vmatprep.subr.mxu1 %v38_v0  ;;  %v33_v6 = vld [vmem:[%s4097_s2 + $0x8] sm:$0xff]  ;;  %v35_v9 = vld [vmem:[%s4097_s2 + $0x18] sm:$0xff]  ;;  %2693 = vst.msk [vmem:[%s4104_s9] sm:$0x3] %vm2692_vm4, %v3621_v4  ;;  %vm2803_vm5 = vcmask 62464  }
   0x3   :  { %3001 = vmatprep.mubr.msk.f32.mxu1 %vm46_vm0, %v36_v1  ;;  %v32_v5 = vld [vmem:[%s4097_s2] sm:$0xff]  ;;  %3000 = vmatpush3.msra.mxu1 %v38_v0  ;;  %v3704_v10 = vpack.c.bf16 %v35_v9, %v34_v7 }
   0x4   :  { %v3696_v8 = vpack.c.bf16 %v33_v6, %v32_v5  ;;  %3002 = vmatmul.mubr.msk.f32.vlgmr.msra.gmra.mrb[0].mxu1 %vm46_vm0, %v37_v2  ;;  %3284 = vmatprep.subr.bf16.mxu1 %v3619_v3  ;;  %v2809_v11 = vld [vmem:[%s4098_s3] ss:$0 sm:$0xff]  ;;  %s3623_s3 = smov 32  }
   0x5   :  { %3012 = vmatprep.mubr.msk.f32.mxu1 %vm3620_vm1, %v3621_v4 }
   0x6   :  { %3286 = vmatpush3.bf16.msra.mxu1 %v3696_v8  ;;  %3292 = vmatpush3.bf16.msra.mxu0 %v3696_v8 }
   0x7   :  { %3287 = vmatprep.subr.bf16.mxu1 %v3619_v3  ;;  %3293 = vmatprep.subr.bf16.mxu0 %v3619_v3 }
   0xa   :  { %3289 = vmatpush3.bf16.msra.mxu1 %v3704_v10  ;;  %3295 = vmatpush3.bf16.msra.mxu0 %v3704_v10 }
   0xb   :  { %3296 = vmatprep.subr.bf16.mxu1 %v3619_v3  ;;  %3302 = vmatprep.subr.bf16.mxu0 %v3619_v3 }
   0xd   :  { %3013 = vmatmul.mubr.f32.vlgmr.msra.gmra.mrb[2].mxu1 %v3621_v4 }
   0xe   :  { %3298 = vmatpush3.bf16.msra.mxu1 %v3696_v8  ;;  %3034 = vmatprep.mubr.msk.f32.mxu1 %vm3620_vm1, %v3621_v4 }
   0xf   :  { %3299 = vmatprep.subr.bf16.mxu1 %v3619_v3 }
  0x12   :  { %3301 = vmatpush3.bf16.msra.mxu1 %v3704_v10 }
  0x13   :  { %3308 = vmatprep.subr.bf16.mxu1 %v3619_v3 }
  0xd7   :  { %v3003_v12 = vpop.f32.mrb[0].mxu1 }
  0xd8   :  { %v3725_v13 = vadd.f32 %v3003_v12, %v2809_v11  ;;  %v119_v14 = vpop.f32.mrb[1].mxu1 }
  0xd9   :  { %v3727_v15 = vadd.f32 %v2809_v11, %v119_v14 }
  0xe0   :  { %v198_v16 = vpop.f32.mrb[2].mxu1 }
  0xe1   :  { %v202_v17 = vadd.f32 %v198_v16, %v3727_v15  ;;  %v3014_v18 = vpop.f32.mrb[3].mxu1 }
  0xe3   :  { %3435 = vtanh.f32 %v202_v17  ;;  %v2812_v20 = vmul.f32 -1.442695, %v202_v17 }
  0xe5   :  { %3437 = vpow2.f32 %v2812_v20 }
  0xed   :  { %v3436_v19 = vpop.eup %3435 }
  0xee   :  { %212 = vrot.lane.b32.xlu0 %v3436_v19, %s3622_s22 }
  0xef   :  { %v3438_v21 = vpop.eup %3437 }
  0xf0   :  { %v206_v22 = vadd.f32 1.0, %v3438_v21 }
  0xf2   :  { %3439 = vrcp.f32 %v206_v22 }
  0xfc   :  { %v3440_v23 = vpop.eup %3439 }
  0xfd   :  { %v210_v26 = vmul.f32 0.0, %v3440_v23 }
 0x160   :  { %v213_v24 = vpop.permute.xlu0 %212 }
 0x161   :  { %v215_v25 = vmul.f32 %v3440_v23, %v213_v24 }
 0x163   :  { %217 = vrot.lane.b32.xlu0 %v215_v25, %s3623_s3 }
 0x1d5   :  { %v218_v27 = vpop.permute.xlu0 %217 }
 0x1d6   :  { %v220_v28 = vadd.f32 %v218_v27, %v210_v26 }
 0x1d8   :  { %3441 = vtanh.f32 %v220_v28  ;;  %v314_v44 = vrot.slane %v220_v28, 6 }
 0x1e2   :  { %v3442_v29 = vpop.eup %3441 }
 0x1e3   :  { %223 = vrot.lane.b32.xlu1 %v3442_v29, %s3622_s22 }
 0x255   :  { %v224_v30 = vpop.permute.xlu1 %223 }
 0x256   :  { %v226_v31 = vmul.f32 %v3440_v23, %v224_v30 }
 0x258   :  { %228 = vrot.lane.b32.xlu1 %v226_v31, %s3623_s3 }
 0x2ca   :  { %v229_v32 = vpop.permute.xlu1 %228 }
 0x2cb   :  { %3024 = vmatmul.mubr.msk.f32.vlgmr.msra.gmra.mrb[0].mxu0 %vm128_vm2, %v229_v32 }
 0x2cc   :  { %3304 = vmatpush3.bf16.msra.mxu0 %v3696_v8  ;;  %3045 = vmatprep.mubr.msk.f32.mxu0 %vm3620_vm1, %v3621_v4 }
 0x2cd   :  { %3305 = vmatprep.subr.bf16.mxu0 %v3619_v3 }
 0x2d0   :  { %3307 = vmatpush3.bf16.msra.mxu0 %v3704_v10 }
 0x2d1   :  { %3314 = vmatprep.subr.bf16.mxu0 %v3619_v3 }
 0x39e   :  { %v298_v33 = vpop.f32.mrb[0].mxu0 }
 0x39f   :  { %v303_v34 = vrot.slane %v298_v33, 6  ;;  %v3025_v35 = vpop.f32.mrb[1].mxu0 }
 0x3a1   :  { %v305_v36 = vadd.f32 %v303_v34, %v3727_v15 }
 0x3a3   :  { %3443 = vtanh.f32 %v305_v36  ;;  %v2814_v38 = vmul.f32 -1.442695, %v305_v36 }
 0x3a5   :  { %3445 = vpow2.f32 %v2814_v38 }
 0x3ad   :  { %v3444_v37 = vpop.eup %3443 }
 0x3ae   :  { %318 = vrot.lane.b32.xlu0 %v3444_v37, %s3622_s22 }
 0x3af   :  { %v3446_v39 = vpop.eup %3445 }
 0x3b0   :  { %v309_v40 = vadd.f32 1.0, %v3446_v39 }
 0x3b2   :  { %3447 = vrcp.f32 %v309_v40 }
 0x3bc   :  { %v3448_v41 = vpop.eup %3447 }
 0x3bd   :  { %v316_v45 = vmul.f32 %v3448_v41, %v314_v44 }
 0x420   :  { %v319_v42 = vpop.permute.xlu0 %318 }
 0x421   :  { %v321_v43 = vmul.f32 %v3448_v41, %v319_v42 }
 0x423   :  { %323 = vrot.lane.b32.xlu1 %v321_v43, %s3623_s3 }
 0x495   :  { %v324_v46 = vpop.permute.xlu1 %323 }
 0x496   :  { %v326_v47 = vadd.f32 %v324_v46, %v316_v45 }
 0x498   :  { %3449 = vtanh.f32 %v326_v47  ;;  %v421_v0 = vrot.slane %v326_v47, 6 }
 0x4a2   :  { %v3450_v48 = vpop.eup %3449 }
 0x4a3   :  { %329 = vrot.lane.b32.xlu0 %v3450_v48, %s3622_s22 }
 0x515   :  { %v330_v49 = vpop.permute.xlu0 %329 }
 0x516   :  { %v332_v50 = vmul.f32 %v3448_v41, %v330_v49 }
 0x518   :  { %v334_v51 = vrot.slane %v332_v50, 2 }
 0x51a   :  { %335 = vrot.lane.b32.xlu1 %v334_v51, %s3623_s3 }
 0x58c   :  { %v336_v52 = vpop.permute.xlu1 %335 }
 0x58d   :  { %3035 = vmatmul.mubr.msk.f32.vlgmr.msra.gmra.mrb[4].mxu1 %vm128_vm2, %v336_v52 }
 0x58e   :  { %3310 = vmatpush3.bf16.msra.mxu1 %v3696_v8  ;;  %3056 = vmatprep.mubr.msk.f32.mxu1 %vm3620_vm1, %v3621_v4 }
 0x58f   :  { %3311 = vmatprep.subr.bf16.mxu1 %v3619_v3 }
 0x592   :  { %3313 = vmatpush3.bf16.msra.mxu1 %v3704_v10 }
 0x593   :  { %3320 = vmatprep.subr.bf16.mxu1 %v3619_v3 }
 0x660   :  { %v405_v53 = vpop.f32.mrb[4].mxu1 }
 0x661   :  { %v410_v54 = vrot.slane %v405_v53, 4  ;;  %v3036_v55 = vpop.f32.mrb[5].mxu1 }
 0x663   :  { %v412_v56 = vadd.f32 %v410_v54, %v3727_v15 }
 0x665   :  { %3451 = vtanh.f32 %v412_v56  ;;  %v2816_v58 = vmul.f32 -1.442695, %v412_v56 }
 0x667   :  { %3453 = vpow2.f32 %v2816_v58 }
 0x66f   :  { %v3452_v57 = vpop.eup %3451 }
 0x670   :  { %425 = vrot.lane.b32.xlu0 %v3452_v57, %s3622_s22 }
 0x671   :  { %v3454_v59 = vpop.eup %3453 }
 0x672   :  { %v416_v60 = vadd.f32 1.0, %v3454_v59 }
 0x674   :  { %3455 = vrcp.f32 %v416_v60 }
 0x67e   :  { %v3456_v61 = vpop.eup %3455 }
 0x67f   :  { %v423_v1 = vmul.f32 %v3456_v61, %v421_v0 }
 0x6e2   :  { %v426_v62 = vpop.permute.xlu0 %425 }
 0x6e3   :  { %v428_v63 = vmul.f32 %v3456_v61, %v426_v62 }
 0x6e5   :  { %430 = vrot.lane.b32.xlu1 %v428_v63, %s3623_s3 }
 0x757   :  { %v431_v2 = vpop.permute.xlu1 %430 }
 0x758   :  { %v433_v5 = vadd.f32 %v431_v2, %v423_v1 }
 0x75a   :  { %3457 = vtanh.f32 %v433_v5  ;;  %v528_v26 = vrot.slane %v433_v5, 6 }
 0x764   :  { %v3458_v6 = vpop.eup %3457 }
 0x765   :  { %436 = vrot.lane.b32.xlu0 %v3458_v6, %s3622_s22 }
 0x7d7   :  { %v437_v7 = vpop.permute.xlu0 %436 }
 0x7d8   :  { %v439_v9 = vmul.f32 %v3456_v61, %v437_v7 }
 0x7da   :  { %v441_v11 = vrot.slane %v439_v9, 4 }
 0x7dc   :  { %442 = vrot.lane.b32.xlu1 %v441_v11, %s3623_s3 }
 0x84e   :  { %v443_v12 = vpop.permute.xlu1 %442 }
 0x84f   :  { %3046 = vmatmul.mubr.msk.f32.vlgmr.msra.gmra.mrb[2].mxu0 %vm128_vm2, %v443_v12 }
 0x850   :  { %3316 = vmatpush3.bf16.msra.mxu0 %v3696_v8  ;;  %3067 = vmatprep.mubr.msk.f32.mxu0 %vm3620_vm1, %v3621_v4 }
 0x851   :  { %3317 = vmatprep.subr.bf16.mxu0 %v3619_v3 }
 0x854   :  { %3319 = vmatpush3.bf16.msra.mxu0 %v3704_v10 }
 0x855   :  { %3326 = vmatprep.subr.bf16.mxu0 %v3619_v3 }
 0x922   :  { %v512_v14 = vpop.f32.mrb[2].mxu0 }
 0x923   :  { %v517_v16 = vrot.slane %v512_v14, 2  ;;  %v3047_v17 = vpop.f32.mrb[3].mxu0 }
 0x925   :  { %v519_v18 = vadd.f32 %v517_v16, %v3727_v15 }
 0x927   :  { %3459 = vtanh.f32 %v519_v18  ;;  %v2818_v20 = vmul.f32 -1.442695, %v519_v18 }
 0x929   :  { %3461 = vpow2.f32 %v2818_v20 }
 0x931   :  { %v3460_v19 = vpop.eup %3459 }
 0x932   :  { %532 = vrot.lane.b32.xlu0 %v3460_v19, %s3622_s22 }
 0x933   :  { %v3462_v21 = vpop.eup %3461 }
 0x934   :  { %v523_v22 = vadd.f32 1.0, %v3462_v21 }
 0x936   :  { %3463 = vrcp.f32 %v523_v22 }
 0x940   :  { %v3464_v23 = vpop.eup %3463 }
 0x941   :  { %v530_v27 = vmul.f32 %v3464_v23, %v528_v26 }
 0x9a4   :  { %v533_v24 = vpop.permute.xlu0 %532 }
 0x9a5   :  { %v535_v25 = vmul.f32 %v3464_v23, %v533_v24 }
 0x9a7   :  { %537 = vrot.lane.b32.xlu1 %v535_v25, %s3623_s3 }
 0xa19   :  { %v538_v28 = vpop.permute.xlu1 %537 }
 0xa1a   :  { %v540_v29 = vadd.f32 %v538_v28, %v530_v27 }
 0xa1c   :  { %3465 = vtanh.f32 %v540_v29  ;;  %v632_v44 = vrot.slane %v540_v29, 6 }
 0xa26   :  { %v3466_v15 = vpop.eup %3465 }
 0xa27   :  { %543 = vrot.lane.b32.xlu0 %v3466_v15, %s3622_s22 }
 0xa99   :  { %v544_v30 = vpop.permute.xlu0 %543 }
 0xa9a   :  { %v546_v31 = vmul.f32 %v3464_v23, %v544_v30 }
 0xa9c   :  { %v548_v32 = vrot.slane %v546_v31, 6 }
 0xa9e   :  { %549 = vrot.lane.b32.xlu1 %v548_v32, %s3623_s3 }
 0xb10   :  { %v550_v33 = vpop.permute.xlu1 %549 }
 0xb11   :  { %3057 = vmatmul.mubr.msk.f32.vlgmr.msra.gmra.mrb[6].mxu1 %vm128_vm2, %v550_v33 }
 0xb12   :  { %3322 = vmatpush3.bf16.msra.mxu1 %v3696_v8  ;;  %3078 = vmatprep.mubr.msk.f32.mxu1 %vm3620_vm1, %v3621_v4 }
 0xb13   :  { %3323 = vmatprep.subr.bf16.mxu1 %v3619_v3 }
 0xb16   :  { %3325 = vmatpush3.bf16.msra.mxu1 %v3704_v10 }
 0xbe4   :  { %v619_v34 = vpop.f32.mrb[6].mxu1 }
 0xbe5   :  { %v623_v35 = vadd.f32 %v619_v34, %v3725_v13  ;;  %v3058_v36 = vpop.f32.mrb[7].mxu1 }
 0xbe7   :  { %3467 = vtanh.f32 %v623_v35  ;;  %v2820_v38 = vmul.f32 -1.442695, %v623_v35 }
 0xbe9   :  { %3469 = vpow2.f32 %v2820_v38 }
 0xbf1   :  { %v3468_v37 = vpop.eup %3467 }
 0xbf2   :  { %636 = vrot.lane.b32.xlu0 %v3468_v37, %s3622_s22 }
 0xbf3   :  { %v3470_v39 = vpop.eup %3469 }
 0xbf4   :  { %v627_v40 = vadd.f32 1.0, %v3470_v39 }
 0xbf6   :  { %3471 = vrcp.f32 %v627_v40 }
 0xc00   :  { %v3472_v41 = vpop.eup %3471 }
 0xc01   :  { %v634_v45 = vmul.f32 %v3472_v41, %v632_v44 }
 0xc64   :  { %v637_v42 = vpop.permute.xlu0 %636 }
 0xc65   :  { %v639_v43 = vmul.f32 %v3472_v41, %v637_v42 }
 0xc67   :  { %641 = vrot.lane.b32.xlu1 %v639_v43, %s3623_s3 }
 0xcd9   :  { %v642_v46 = vpop.permute.xlu1 %641 }
 0xcda   :  { %v644_v47 = vadd.f32 %v642_v46, %v634_v45  ;;  %v3814_v46 = vld [vmem:[%s4100_s7] sm:$0xff] }
 0xcdc   :  { %3473 = vtanh.f32 %v644_v47 }
 0xce6   :  { %v3474_v48 = vpop.eup %3473 }
 0xce7   :  { %647 = vrot.lane.b32.xlu0 %v3474_v48, %s3622_s22  ;;  %v972_v48 = vld [vmem:[%s4101_s5] sm:$0xff] }
 0xd59   :  { %v648_v49 = vpop.permute.xlu0 %647 }
 0xd5a   :  { %v650_v50 = vmul.f32 %v3472_v41, %v648_v49  ;;  %v973_v49 = vld [vmem:[%s4101_s5 + $0x8] sm:$0xff] }
 0xd5c   :  { %652 = vrot.lane.b32.xlu1 %v650_v50, %s3623_s3  ;;  %v3832_v50 = vld [vmem:[%s4100_s7 + $0x10] sm:$0xff] }
 0xdce   :  { %v653_v51 = vpop.permute.xlu1 %652 }
 0xdcf   :  { %3068 = vmatmul.mubr.msk.f32.vlgmr.msra.gmra.mrb[4].mxu0 %vm128_vm2, %v653_v51  ;;  %v3333_v51 = vpack.c.bf16 %v973_v49, %v972_v48 }
 0xdd0   :  { %3328 = vmatpush3.bf16.msra.mxu0 %v3696_v8  ;;  %3089 = vmatprep.mubr.msk.f32.mxu0 %vm3620_vm1, %v3621_v4 }
 0xdd1   :  { %3329 = vmatprep.subr.bf16.mxu0 %v3619_v3 }
 0xdd4   :  { %3331 = vmatpush3.bf16.msra.mxu0 %v3704_v10  ;;  %v738_v10 = vrot.slane %v644_v47, 6  ;;  %v3819_v47 = vld [vmem:[%s4100_s7 + $0x8] sm:$0xff] }
 0xdd5   :  { %3100 = vmatprep.subr.mxu0 %v3621_v4 }
 0xea2   :  { %v722_v52 = vpop.f32.mrb[4].mxu0 }
 0xea3   :  { %v727_v53 = vrot.slane %v722_v52, 6  ;;  %v3069_v54 = vpop.f32.mrb[5].mxu0  ;;  %v974_v52 = vld [vmem:[%s4101_s5 + $0x10] sm:$0xff] }
 0xea4   :  { %v3848_v54 = vld [vmem:[%s4100_s7 + $0x18] sm:$0xff] }
 0xea5   :  { %v729_v55 = vadd.f32 %v727_v53, %v3725_v13  ;;  %v975_v53 = vld [vmem:[%s4101_s5 + $0x18] sm:$0xff] }
 0xea7   :  { %3475 = vtanh.f32 %v729_v55  ;;  %v2822_v57 = vmul.f32 -1.442695, %v729_v55  ;;  %v3336_v55 = vpack.c.bf16 %v975_v53, %v974_v52 }
 0xea9   :  { %3477 = vpow2.f32 %v2822_v57  ;;  %v3861_v57 = vld [vmem:[%s4102_s8] sm:$0x1] }
 0xeb1   :  { %v3476_v56 = vpop.eup %3475 }
 0xeb2   :  { %742 = vrot.lane.b32.xlu0 %v3476_v56, %s3622_s22 }
 0xeb3   :  { %v3478_v8 = vpop.eup %3477 }
 0xeb4   :  { %v733_v58 = vadd.f32 1.0, %v3478_v8 }
 0xeb6   :  { %3479 = vrcp.f32 %v733_v58 }
 0xec0   :  { %v3480_v59 = vpop.eup %3479 }
 0xec1   :  { %v740_v62 = vmul.f32 %v3480_v59, %v738_v10 }
 0xf24   :  { %v743_v60 = vpop.permute.xlu0 %742 }
 0xf25   :  { %v745_v61 = vmul.f32 %v3480_v59, %v743_v60 }
 0xf27   :  { %747 = vrot.lane.b32.xlu1 %v745_v61, %s3623_s3 }
 0xf99   :  { %v748_v63 = vpop.permute.xlu1 %747 }
 0xf9a   :  { %v750_v0 = vadd.f32 %v748_v63, %v740_v62 }
 0xf9c   :  { %3481 = vtanh.f32 %v750_v0  ;;  %v845_v23 = vrot.slane %v750_v0, 6 }
 0xfa6   :  { %v3482_v1 = vpop.eup %3481 }
 0xfa7   :  { %753 = vrot.lane.b32.xlu0 %v3482_v1, %s3622_s22 }
0x1019   :  { %v754_v2 = vpop.permute.xlu0 %753 }
0x101a   :  { %v756_v5 = vmul.f32 %v3480_v59, %v754_v2 }
0x101c   :  { %v758_v6 = vrot.slane %v756_v5, 2 }
0x101e   :  { %759 = vrot.lane.b32.xlu1 %v758_v6, %s3623_s3 }
0x1090   :  { %v760_v7 = vpop.permute.xlu1 %759 }
0x1091   :  { %3079 = vmatmul.mubr.msk.f32.vlgmr.msra.gmra.mrb[8].mxu1 %vm128_vm2, %v760_v7 }
0x1092   :  { %3094 = vmatprep.mubr.msk.f32.mxu1 %vm46_vm0, %v3814_v46 }
0x1164   :  { %v829_v9 = vpop.f32.mrb[8].mxu1 }
0x1165   :  { %v834_v11 = vrot.slane %v829_v9, 4  ;;  %v3080_v12 = vpop.f32.mrb[9].mxu1  ;;  %v1158_v9 = vlaneseq }
0x1167   :  { %v836_v14 = vadd.f32 %v834_v11, %v3725_v13  ;;  %v1159_v11 = vshrl.u32 %v1158_v9, 7 }
0x1169   :  { %3483 = vtanh.f32 %v836_v14  ;;  %v2824_v17 = vmul.f32 -1.442695, %v836_v14  ;;  %v3883_v12 = vsub.s32 0, %v1159_v11  ;;  %v976_v14 = vld [vmem:[%s4103_s6] sm:$0x1] }
0x116b   :  { %3485 = vpow2.f32 %v2824_v17 }
0x1173   :  { %v3484_v16 = vpop.eup %3483 }
0x1174   :  { %849 = vrot.lane.b32.xlu0 %v3484_v16, %s3622_s22  ;;  %v1167_v16 = vrot.slane %v976_v14, %v3883_v12 }
0x1175   :  { %v3486_v18 = vpop.eup %3485 }
0x1176   :  { %v840_v19 = vadd.f32 1.0, %v3486_v18 }
0x1178   :  { %3487 = vrcp.f32 %v840_v19 }
0x1182   :  { %v3488_v20 = vpop.eup %3487 }
0x1183   :  { %v847_v24 = vmul.f32 %v3488_v20, %v845_v23 }
0x11e6   :  { %v850_v21 = vpop.permute.xlu0 %849 }
0x11e7   :  { %v852_v22 = vmul.f32 %v3488_v20, %v850_v21 }
0x11e9   :  { %854 = vrot.lane.b32.xlu1 %v852_v22, %s3623_s3 }
0x125b   :  { %v855_v25 = vpop.permute.xlu1 %854 }
0x125c   :  { %v857_v26 = vadd.f32 %v855_v25, %v847_v24 }
0x125e   :  { %3489 = vtanh.f32 %v857_v26  ;;  %v952_v42 = vrot.slane %v857_v26, 6 }
0x1268   :  { %v3490_v27 = vpop.eup %3489 }
0x1269   :  { %860 = vrot.lane.b32.xlu0 %v3490_v27, %s3622_s22 }
0x12db   :  { %v861_v28 = vpop.permute.xlu0 %860 }
0x12dc   :  { %v863_v29 = vmul.f32 %v3488_v20, %v861_v28 }
0x12de   :  { %v865_v15 = vrot.slane %v863_v29, 4 }
0x12e0   :  { %866 = vrot.lane.b32.xlu1 %v865_v15, %s3623_s3 }
0x1352   :  { %v867_v30 = vpop.permute.xlu1 %866 }
0x1353   :  { %3090 = vmatmul.mubr.msk.f32.vlgmr.msra.gmra.mrb[6].mxu0 %vm128_vm2, %v867_v30 }
0x1354   :  { %3102 = vmatprep.mubr.msk.f32.mxu0 %vm3620_vm1, %v3621_v4 }
0x1426   :  { %v936_v31 = vpop.f32.mrb[6].mxu0 }
0x1427   :  { %v941_v32 = vrot.slane %v936_v31, 2  ;;  %v3091_v33 = vpop.f32.mrb[7].mxu0 }
0x1429   :  { %v943_v34 = vadd.f32 %v941_v32, %v3725_v13  ;;  %v971_v13 = vld [vmem:[%s4099_s4] sm:$0xff] }
0x142a   :  { %3092 = vmatprep.subr.mxu1 %v971_v13  ;;  %3101 = vmatpush3.msra.mxu0 %v971_v13 }
0x142b   :  { %3491 = vtanh.f32 %v943_v34  ;;  %v2826_v36 = vmul.f32 -1.442695, %v943_v34  ;;  %3093 = vmatpush3.msra.mxu1 %v971_v13  ;;  %3338 = vmatprep.subr.bf16.mxu0 %v3619_v3 }
0x142c   :  { %3095 = vmatmul.mubr.msk.f32.vlgmr.msra.gmra.mrb[10].mxu1 %vm46_vm0, %v3819_v47  ;;  %3332 = vmatprep.subr.bf16.mxu1 %v3619_v3 }
0x142d   :  { %3493 = vpow2.f32 %v2826_v36  ;;  %3334 = vmatpush3.bf16.msra.mxu1 %v3333_v51  ;;  %3097 = vmatprep.mubr.msk.f32.mxu1 %vm46_vm0, %v3832_v50 }
0x142e   :  { %3335 = vmatprep.subr.bf16.mxu1 %v3619_v3  ;;  %3103 = vmatmul.mubr.msk.f32.vlgmr.msra.gmra.mrb[8].mxu0 %vm46_vm0, %v3861_v57 }
0x142f   :  { %3124 = vmatprep.mubr.msk.f32.mxu0 %vm3620_vm1, %v3621_v4 }
0x1430   :  { %3098 = vmatmul.mubr.msk.f32.gmra.mrb[12].mxu1 %vm46_vm0, %v3848_v54 }
0x1431   :  { %3337 = vmatpush3.bf16.msra.mxu1 %v3336_v55  ;;  %3113 = vmatprep.mubr.msk.f32.mxu1 %vm3620_vm1, %v3621_v4 }
0x1432   :  { %3344 = vmatprep.subr.bf16.mxu1 %v3619_v3 }
0x1435   :  { %v3492_v35 = vpop.eup %3491 }
0x1436   :  { %956 = vrot.lane.b32.xlu0 %v3492_v35, %s3622_s22 }
0x1437   :  { %v3494_v37 = vpop.eup %3493 }
0x1438   :  { %v947_v38 = vadd.f32 1.0, %v3494_v37 }
0x143a   :  { %3495 = vrcp.f32 %v947_v38 }
0x1444   :  { %v3496_v39 = vpop.eup %3495 }
0x1445   :  { %v954_v43 = vmul.f32 %v3496_v39, %v952_v42 }
0x14a8   :  { %v957_v40 = vpop.permute.xlu0 %956 }
0x14a9   :  { %v959_v41 = vmul.f32 %v3496_v39, %v957_v40 }
0x14ab   :  { %961 = vrot.lane.b32.xlu1 %v959_v41, %s3623_s3 }
0x14ff   :  { %v3096_v60 = vpop.f32.mrb[10].mxu1 }
0x1500   :  { %v1080_v61 = vadd.f32 %v3096_v60, %v973_v49  ;;  %v1060_v10 = vpop.f32.mrb[11].mxu1 }
0x1501   :  { %v1079_v62 = vadd.f32 %v1060_v10, %v972_v48  ;;  %v1152_v31 = vpop.f32.mrb[8].mxu0 }
0x1502   :  { %v3104_v32 = vpop.f32.mrb[9].mxu0  ;;  %v1156_v36 = vadd.f32 %v1152_v31, %v976_v14 }
0x1503   :  { %v3868_v63 = vpack.c.bf16 %v1080_v61, %v1079_v62  ;;  %v3099_v0 = vpop.f32.mrb[12].mxu1 }
0x1504   :  { %v1082_v1 = vadd.f32 %v3099_v0, %v975_v53  ;;  %v1070_v2 = vpop.f32.mrb[13].mxu1  ;;  %v3903_v37 = vrot.slane %v1156_v36, %v3883_v12 }
0x1505   :  { %v1081_v5 = vadd.f32 %v1070_v2, %v974_v52  ;;  %3340 = vmatpush3.bf16.msra.mxu0 %v3868_v63 }
0x1506   :  { %3341 = vmatprep.subr.bf16.mxu0 %v3619_v3 }
0x1507   :  { %v3872_v6 = vpack.c.bf16 %v1082_v1, %v1081_v5 }
0x1509   :  { %3343 = vmatpush3.bf16.msra.mxu0 %v3872_v6 }
0x150a   :  { %3350 = vmatprep.subr.bf16.mxu0 %v3619_v3 }
0x151d   :  { %v962_v44 = vpop.permute.xlu1 %961 }
0x151e   :  { %v3805_v45 = vadd.f32 %v962_v44, %v954_v43 }
0x1520   :  { %3497 = vtanh.f32 %v3805_v45  ;;  %v1253_v27 = vrot.slane %v3805_v45, 6 }
0x152a   :  { %v3498_v56 = vpop.eup %3497 }
0x152b   :  { %967 = vrot.lane.b32.xlu0 %v3498_v56, %s3622_s22 }
0x159d   :  { %v968_v8 = vpop.permute.xlu0 %967 }
0x159e   :  { %v970_v58 = vmul.f32 %v3496_v39, %v968_v8 }
0x15a0   :  { %v1170_v59 = vrot.slane %v970_v58, 6 }
0x15a2   :  { %1171 = vrot.lane.b32.xlu1 %v1170_v59, %s3623_s3 }
0x1614   :  { %v1172_v7 = vpop.permute.xlu1 %1171 }
0x1615   :  { %3114 = vmatmul.mubr.msk.f32.vlgmr.msra.gmra.mrb[14].mxu1 %vm128_vm2, %v1172_v7 }
0x1616   :  { %3346 = vmatpush3.bf16.msra.mxu1 %v3868_v63  ;;  %3135 = vmatprep.mubr.msk.f32.mxu1 %vm3620_vm1, %v3621_v4 }
0x1617   :  { %3347 = vmatprep.subr.bf16.mxu1 %v3619_v3 }
0x161a   :  { %3349 = vmatpush3.bf16.msra.mxu1 %v3872_v6 }
0x161b   :  { %3356 = vmatprep.subr.bf16.mxu1 %v3619_v3 }
0x16e8   :  { %v1241_v17 = vpop.f32.mrb[14].mxu1 }
0x16e9   :  { %v1242_v18 = vadd.f32 %v1241_v17, %v1167_v16  ;;  %v3115_v19 = vpop.f32.mrb[15].mxu1 }
0x16eb   :  { %3499 = vtanh.f32 %v1242_v18  ;;  %v2833_v21 = vmul.f32 -1.442695, %v1242_v18 }
0x16ed   :  { %3501 = vpow2.f32 %v2833_v21 }
0x16f5   :  { %v3500_v20 = vpop.eup %3499 }
0x16f6   :  { %1257 = vrot.lane.b32.xlu0 %v3500_v20, %s3622_s22 }
0x16f7   :  { %v3502_v22 = vpop.eup %3501 }
0x16f8   :  { %v1248_v23 = vadd.f32 1.0, %v3502_v22 }
0x16fa   :  { %3503 = vrcp.f32 %v1248_v23 }
0x1704   :  { %v3504_v24 = vpop.eup %3503 }
0x1705   :  { %v1255_v28 = vmul.f32 %v3504_v24, %v1253_v27 }
0x1768   :  { %v1258_v25 = vpop.permute.xlu0 %1257 }
0x1769   :  { %v1260_v26 = vmul.f32 %v3504_v24, %v1258_v25 }
0x176b   :  { %1262 = vrot.lane.b32.xlu1 %v1260_v26, %s3623_s3 }
0x17dd   :  { %v1263_v29 = vpop.permute.xlu1 %1262 }
0x17de   :  { %v1265_v15 = vadd.f32 %v1263_v29, %v1255_v28 }
0x17e0   :  { %3505 = vtanh.f32 %v1265_v15 }
0x17ea   :  { %v3506_v30 = vpop.eup %3505 }
0x17eb   :  { %1268 = vrot.lane.b32.xlu0 %v3506_v30, %s3622_s22 }
0x185d   :  { %v1269_v33 = vpop.permute.xlu0 %1268 }
0x185e   :  { %v1271_v34 = vmul.f32 %v3504_v24, %v1269_v33 }
0x1860   :  { %1273 = vrot.lane.b32.xlu1 %v1271_v34, %s3623_s3 }
0x18d2   :  { %v1274_v35 = vpop.permute.xlu1 %1273 }
0x18d3   :  { %1277 = vst.msk [vmem:[#allocation2] sm:$0x3] %vm1276_vm3, %v1274_v35  ;;  %3125 = vmatmul.mubr.msk.f32.vlgmr.msra.gmra.mrb[10].mxu0 %vm128_vm2, %v1274_v35 }
0x18d4   :  { %3352 = vmatpush3.bf16.msra.mxu0 %v3868_v63  ;;  %3146 = vmatprep.mubr.msk.f32.mxu0 %vm3620_vm1, %v3621_v4 }
0x18d5   :  { %3353 = vmatprep.subr.bf16.mxu0 %v3619_v3 }
0x18d8   :  { %3355 = vmatpush3.bf16.msra.mxu0 %v3872_v6 }
0x18d9   :  { %3362 = vmatprep.subr.bf16.mxu0 %v3619_v3 }
0x19a6   :  { %v1346_v38 = vpop.f32.mrb[10].mxu0 }
0x19a7   :  { %v1347_v39 = vadd.f32 %v1346_v38, %v3903_v37  ;;  %v3126_v40 = vpop.f32.mrb[11].mxu0 }
0x19a9   :  { %3507 = vtanh.f32 %v1347_v39  ;;  %v2835_v42 = vmul.f32 -1.442695, %v1347_v39 }
0x19ab   :  { %3509 = vpow2.f32 %v2835_v42 }
0x19b3   :  { %v3508_v41 = vpop.eup %3507 }
0x19b4   :  { %1359 = vrot.lane.b32.xlu0 %v3508_v41, %s3622_s22 }
0x19b5   :  { %v3510_v43 = vpop.eup %3509 }
0x19b6   :  { %v1353_v44 = vadd.f32 1.0, %v3510_v43 }
0x19b8   :  { %3511 = vrcp.f32 %v1353_v44 }
0x19c2   :  { %v3512_v45 = vpop.eup %3511 }
0x19c3   :  { %v1357_v49 = vmul.f32 %v3512_v45, %v1265_v15 }
0x1a26   :  { %v1360_v13 = vpop.permute.xlu0 %1359 }
0x1a27   :  { %v1362_v48 = vmul.f32 %v3512_v45, %v1360_v13 }
0x1a29   :  { %1364 = vrot.lane.b32.xlu1 %v1362_v48, %s3623_s3 }
0x1a9b   :  { %v1365_v51 = vpop.permute.xlu1 %1364 }
0x1a9c   :  { %v1367_v52 = vadd.f32 %v1365_v51, %v1357_v49 }
0x1a9e   :  { %3513 = vtanh.f32 %v1367_v52 }
0x1aa8   :  { %v3514_v53 = vpop.eup %3513 }
0x1aa9   :  { %1370 = vrot.lane.b32.xlu0 %v3514_v53, %s3622_s22 }
0x1b1b   :  { %v1371_v55 = vpop.permute.xlu0 %1370 }
0x1b1c   :  { %v1373_v56 = vmul.f32 %v3512_v45, %v1371_v55 }
0x1b1e   :  { %1375 = vrot.lane.b32.xlu1 %v1373_v56, %s3623_s3 }
0x1b90   :  { %v1376_v8 = vpop.permute.xlu1 %1375 }
0x1b91   :  { %1378 = vst.msk [vmem:[#allocation2 + $0x2] sm:$0x3] %vm1276_vm3, %v1376_v8  ;;  %3136 = vmatmul.mubr.msk.f32.vlgmr.msra.gmra.mrb[16].mxu1 %vm128_vm2, %v1376_v8 }
0x1b92   :  { %3358 = vmatpush3.bf16.msra.mxu1 %v3868_v63  ;;  %3157 = vmatprep.mubr.msk.f32.mxu1 %vm3620_vm1, %v3621_v4 }
0x1b93   :  { %3359 = vmatprep.subr.bf16.mxu1 %v3619_v3 }
0x1b96   :  { %3361 = vmatpush3.bf16.msra.mxu1 %v3872_v6 }
0x1b97   :  { %3368 = vmatprep.subr.bf16.mxu1 %v3619_v3 }
0x1c64   :  { %v1447_v58 = vpop.f32.mrb[16].mxu1 }
0x1c65   :  { %v1448_v59 = vadd.f32 %v1447_v58, %v3903_v37  ;;  %v3137_v60 = vpop.f32.mrb[17].mxu1 }
0x1c67   :  { %3515 = vtanh.f32 %v1448_v59  ;;  %v2837_v10 = vmul.f32 -1.442695, %v1448_v59 }
0x1c69   :  { %3517 = vpow2.f32 %v2837_v10 }
0x1c71   :  { %v3516_v61 = vpop.eup %3515 }
0x1c72   :  { %1460 = vrot.lane.b32.xlu0 %v3516_v61, %s3622_s22 }
0x1c73   :  { %v3518_v62 = vpop.eup %3517 }
0x1c74   :  { %v1454_v0 = vadd.f32 1.0, %v3518_v62 }
0x1c76   :  { %3519 = vrcp.f32 %v1454_v0 }
0x1c80   :  { %v3520_v1 = vpop.eup %3519 }
0x1c81   :  { %v1458_v7 = vmul.f32 %v3520_v1, %v1367_v52 }
0x1ce4   :  { %v1461_v2 = vpop.permute.xlu0 %1460 }
0x1ce5   :  { %v1463_v5 = vmul.f32 %v3520_v1, %v1461_v2 }
0x1ce7   :  { %1465 = vrot.lane.b32.xlu1 %v1463_v5, %s3623_s3 }
0x1d59   :  { %v1466_v9 = vpop.permute.xlu1 %1465 }
0x1d5a   :  { %v1468_v11 = vadd.f32 %v1466_v9, %v1458_v7 }
0x1d5c   :  { %3521 = vtanh.f32 %v1468_v11 }
0x1d66   :  { %v3522_v14 = vpop.eup %3521 }
0x1d67   :  { %1471 = vrot.lane.b32.xlu0 %v3522_v14, %s3622_s22 }
0x1dd9   :  { %v1472_v16 = vpop.permute.xlu0 %1471 }
0x1dda   :  { %v1474_v17 = vmul.f32 %v3520_v1, %v1472_v16 }
0x1ddc   :  { %1476 = vrot.lane.b32.xlu1 %v1474_v17, %s3623_s3 }
0x1e4e   :  { %v1477_v18 = vpop.permute.xlu1 %1476 }
0x1e4f   :  { %1479 = vst.msk [vmem:[#allocation2 + $0x4] sm:$0x3] %vm1276_vm3, %v1477_v18  ;;  %3147 = vmatmul.mubr.msk.f32.vlgmr.msra.gmra.mrb[12].mxu0 %vm128_vm2, %v1477_v18 }
0x1e50   :  { %3364 = vmatpush3.bf16.msra.mxu0 %v3868_v63  ;;  %3168 = vmatprep.mubr.msk.f32.mxu0 %vm3620_vm1, %v3621_v4 }
0x1e51   :  { %3365 = vmatprep.subr.bf16.mxu0 %v3619_v3 }
0x1e54   :  { %3367 = vmatpush3.bf16.msra.mxu0 %v3872_v6 }
0x1e55   :  { %3374 = vmatprep.subr.bf16.mxu0 %v3619_v3 }
0x1f22   :  { %v1548_v19 = vpop.f32.mrb[12].mxu0 }
0x1f23   :  { %v1549_v20 = vadd.f32 %v1548_v19, %v3903_v37  ;;  %v3148_v21 = vpop.f32.mrb[13].mxu0 }
0x1f25   :  { %3523 = vtanh.f32 %v1549_v20  ;;  %v2839_v23 = vmul.f32 -1.442695, %v1549_v20 }
0x1f27   :  { %3525 = vpow2.f32 %v2839_v23 }
0x1f2f   :  { %v3524_v22 = vpop.eup %3523 }
0x1f30   :  { %1561 = vrot.lane.b32.xlu0 %v3524_v22, %s3622_s22 }
0x1f31   :  { %v3526_v24 = vpop.eup %3525 }
0x1f32   :  { %v1555_v25 = vadd.f32 1.0, %v3526_v24 }
0x1f34   :  { %3527 = vrcp.f32 %v1555_v25 }
0x1f3e   :  { %v3528_v26 = vpop.eup %3527 }
0x1f3f   :  { %v1559_v29 = vmul.f32 %v3528_v26, %v1468_v11 }
0x1fa2   :  { %v1562_v27 = vpop.permute.xlu0 %1561 }
0x1fa3   :  { %v1564_v28 = vmul.f32 %v3528_v26, %v1562_v27 }
0x1fa5   :  { %1566 = vrot.lane.b32.xlu1 %v1564_v28, %s3623_s3 }
0x2017   :  { %v1567_v15 = vpop.permute.xlu1 %1566 }
0x2018   :  { %v1569_v30 = vadd.f32 %v1567_v15, %v1559_v29 }
0x201a   :  { %3529 = vtanh.f32 %v1569_v30 }
0x2024   :  { %v3530_v31 = vpop.eup %3529 }
0x2025   :  { %1572 = vrot.lane.b32.xlu0 %v3530_v31, %s3622_s22 }
0x2097   :  { %v1573_v32 = vpop.permute.xlu0 %1572 }
0x2098   :  { %v1575_v33 = vmul.f32 %v3528_v26, %v1573_v32 }
0x209a   :  { %1577 = vrot.lane.b32.xlu1 %v1575_v33, %s3623_s3 }
0x210c   :  { %v1578_v34 = vpop.permute.xlu1 %1577 }
0x210d   :  { %1580 = vst.msk [vmem:[#allocation2 + $0x6] sm:$0x3] %vm1276_vm3, %v1578_v34  ;;  %3158 = vmatmul.mubr.msk.f32.vlgmr.msra.gmra.mrb[18].mxu1 %vm128_vm2, %v1578_v34 }
0x210e   :  { %3370 = vmatpush3.bf16.msra.mxu1 %v3868_v63  ;;  %3179 = vmatprep.mubr.msk.f32.mxu1 %vm3620_vm1, %v3621_v4 }
0x210f   :  { %3371 = vmatprep.subr.bf16.mxu1 %v3619_v3 }
0x2112   :  { %3373 = vmatpush3.bf16.msra.mxu1 %v3872_v6 }
0x2113   :  { %3380 = vmatprep.subr.bf16.mxu1 %v3619_v3 }
0x21e0   :  { %v1649_v35 = vpop.f32.mrb[18].mxu1 }
0x21e1   :  { %v1650_v36 = vadd.f32 %v1649_v35, %v3903_v37  ;;  %v3159_v38 = vpop.f32.mrb[19].mxu1 }
0x21e3   :  { %3531 = vtanh.f32 %v1650_v36  ;;  %v2841_v40 = vmul.f32 -1.442695, %v1650_v36 }
0x21e5   :  { %3533 = vpow2.f32 %v2841_v40 }
0x21ed   :  { %v3532_v39 = vpop.eup %3531 }
0x21ee   :  { %1662 = vrot.lane.b32.xlu0 %v3532_v39, %s3622_s22 }
0x21ef   :  { %v3534_v41 = vpop.eup %3533 }
0x21f0   :  { %v1656_v42 = vadd.f32 1.0, %v3534_v41 }
0x21f2   :  { %3535 = vrcp.f32 %v1656_v42 }
0x21fc   :  { %v3536_v43 = vpop.eup %3535 }
0x21fd   :  { %v1660_v13 = vmul.f32 %v3536_v43, %v1569_v30 }
0x2260   :  { %v1663_v44 = vpop.permute.xlu0 %1662 }
0x2261   :  { %v1665_v45 = vmul.f32 %v3536_v43, %v1663_v44 }
0x2263   :  { %1667 = vrot.lane.b32.xlu1 %v1665_v45, %s3623_s3 }
0x22d5   :  { %v1668_v48 = vpop.permute.xlu1 %1667 }
0x22d6   :  { %v1670_v49 = vadd.f32 %v1668_v48, %v1660_v13 }
0x22d8   :  { %3537 = vtanh.f32 %v1670_v49 }
0x22e2   :  { %v3538_v51 = vpop.eup %3537 }
0x22e3   :  { %1673 = vrot.lane.b32.xlu0 %v3538_v51, %s3622_s22 }
0x2355   :  { %v1674_v52 = vpop.permute.xlu0 %1673 }
0x2356   :  { %v1676_v53 = vmul.f32 %v3536_v43, %v1674_v52 }
0x2358   :  { %1678 = vrot.lane.b32.xlu1 %v1676_v53, %s3623_s3 }
0x23ca   :  { %v1679_v55 = vpop.permute.xlu1 %1678 }
0x23cb   :  { %1681 = vst.msk [vmem:[#allocation2 + $0x8] sm:$0x3] %vm1276_vm3, %v1679_v55  ;;  %3169 = vmatmul.mubr.msk.f32.vlgmr.msra.gmra.mrb[14].mxu0 %vm128_vm2, %v1679_v55 }
0x23cc   :  { %3376 = vmatpush3.bf16.msra.mxu0 %v3868_v63  ;;  %3190 = vmatprep.mubr.msk.f32.mxu0 %vm3620_vm1, %v3621_v4 }
0x23cd   :  { %3377 = vmatprep.subr.bf16.mxu0 %v3619_v3 }
0x23d0   :  { %3379 = vmatpush3.bf16.msra.mxu0 %v3872_v6 }
0x23d1   :  { %3386 = vmatprep.subr.bf16.mxu0 %v3619_v3 }
0x249e   :  { %v1750_v56 = vpop.f32.mrb[14].mxu0 }
0x249f   :  { %v1751_v8 = vadd.f32 %v1750_v56, %v3903_v37  ;;  %v3170_v58 = vpop.f32.mrb[15].mxu0 }
0x24a1   :  { %3539 = vtanh.f32 %v1751_v8  ;;  %v2843_v60 = vmul.f32 -1.442695, %v1751_v8 }
0x24a3   :  { %3541 = vpow2.f32 %v2843_v60 }
0x24ab   :  { %v3540_v59 = vpop.eup %3539 }
0x24ac   :  { %1763 = vrot.lane.b32.xlu0 %v3540_v59, %s3622_s22 }
0x24ad   :  { %v3542_v61 = vpop.eup %3541 }
0x24ae   :  { %v1757_v10 = vadd.f32 1.0, %v3542_v61 }
0x24b0   :  { %3543 = vrcp.f32 %v1757_v10 }
0x24ba   :  { %v3544_v62 = vpop.eup %3543 }
0x24bb   :  { %v1761_v2 = vmul.f32 %v3544_v62, %v1670_v49 }
0x251e   :  { %v1764_v0 = vpop.permute.xlu0 %1763 }
0x251f   :  { %v1766_v1 = vmul.f32 %v3544_v62, %v1764_v0 }
0x2521   :  { %1768 = vrot.lane.b32.xlu1 %v1766_v1, %s3623_s3 }
0x2593   :  { %v1769_v5 = vpop.permute.xlu1 %1768 }
0x2594   :  { %v1771_v7 = vadd.f32 %v1769_v5, %v1761_v2 }
0x2596   :  { %3545 = vtanh.f32 %v1771_v7 }
0x25a0   :  { %v3546_v9 = vpop.eup %3545 }
0x25a1   :  { %1774 = vrot.lane.b32.xlu0 %v3546_v9, %s3622_s22 }
0x2613   :  { %v1775_v11 = vpop.permute.xlu0 %1774 }
0x2614   :  { %v1777_v14 = vmul.f32 %v3544_v62, %v1775_v11 }
0x2616   :  { %1779 = vrot.lane.b32.xlu1 %v1777_v14, %s3623_s3 }
0x2688   :  { %v1780_v16 = vpop.permute.xlu1 %1779 }
0x2689   :  { %1782 = vst.msk [vmem:[#allocation2 + $0xa] sm:$0x3] %vm1276_vm3, %v1780_v16  ;;  %3180 = vmatmul.mubr.msk.f32.vlgmr.msra.gmra.mrb[20].mxu1 %vm128_vm2, %v1780_v16 }
0x268a   :  { %3382 = vmatpush3.bf16.msra.mxu1 %v3868_v63  ;;  %3201 = vmatprep.mubr.msk.f32.mxu1 %vm3620_vm1, %v3621_v4 }
0x268b   :  { %3383 = vmatprep.subr.bf16.mxu1 %v3619_v3 }
0x268e   :  { %3385 = vmatpush3.bf16.msra.mxu1 %v3872_v6 }
0x268f   :  { %3392 = vmatprep.subr.bf16.mxu1 %v3619_v3 }
0x275c   :  { %v1851_v17 = vpop.f32.mrb[20].mxu1 }
0x275d   :  { %v1852_v18 = vadd.f32 %v1851_v17, %v3903_v37  ;;  %v3181_v19 = vpop.f32.mrb[21].mxu1 }
0x275f   :  { %3547 = vtanh.f32 %v1852_v18  ;;  %v2845_v21 = vmul.f32 -1.442695, %v1852_v18 }
0x2761   :  { %3549 = vpow2.f32 %v2845_v21 }
0x2769   :  { %v3548_v20 = vpop.eup %3547 }
0x276a   :  { %1864 = vrot.lane.b32.xlu0 %v3548_v20, %s3622_s22 }
0x276b   :  { %v3550_v22 = vpop.eup %3549 }
0x276c   :  { %v1858_v23 = vadd.f32 1.0, %v3550_v22 }
0x276e   :  { %3551 = vrcp.f32 %v1858_v23 }
0x2778   :  { %v3552_v24 = vpop.eup %3551 }
0x2779   :  { %v1862_v27 = vmul.f32 %v3552_v24, %v1771_v7 }
0x27dc   :  { %v1865_v25 = vpop.permute.xlu0 %1864 }
0x27dd   :  { %v1867_v26 = vmul.f32 %v3552_v24, %v1865_v25 }
0x27df   :  { %1869 = vrot.lane.b32.xlu1 %v1867_v26, %s3623_s3 }
0x2851   :  { %v1870_v28 = vpop.permute.xlu1 %1869 }
0x2852   :  { %v1872_v29 = vadd.f32 %v1870_v28, %v1862_v27 }
0x2854   :  { %3553 = vtanh.f32 %v1872_v29 }
0x285e   :  { %v3554_v15 = vpop.eup %3553 }
0x285f   :  { %1875 = vrot.lane.b32.xlu0 %v3554_v15, %s3622_s22 }
0x28d1   :  { %v1876_v30 = vpop.permute.xlu0 %1875 }
0x28d2   :  { %v1878_v31 = vmul.f32 %v3552_v24, %v1876_v30 }
0x28d4   :  { %1880 = vrot.lane.b32.xlu1 %v1878_v31, %s3623_s3 }
0x2946   :  { %v1881_v32 = vpop.permute.xlu1 %1880 }
0x2947   :  { %1883 = vst.msk [vmem:[#allocation2 + $0xc] sm:$0x3] %vm1276_vm3, %v1881_v32  ;;  %3191 = vmatmul.mubr.msk.f32.vlgmr.msra.gmra.mrb[16].mxu0 %vm128_vm2, %v1881_v32 }
0x2948   :  { %3388 = vmatpush3.bf16.msra.mxu0 %v3868_v63  ;;  %3212 = vmatprep.mubr.msk.f32.mxu0 %vm3620_vm1, %v3621_v4 }
0x2949   :  { %3389 = vmatprep.subr.bf16.mxu0 %v3619_v3 }
0x294c   :  { %3391 = vmatpush3.bf16.msra.mxu0 %v3872_v6 }
0x294d   :  { %3398 = vmatprep.subr.bf16.mxu0 %v3619_v3 }
0x2a1a   :  { %v1952_v33 = vpop.f32.mrb[16].mxu0 }
0x2a1b   :  { %v1953_v34 = vadd.f32 %v1952_v33, %v3903_v37  ;;  %v3192_v35 = vpop.f32.mrb[17].mxu0 }
0x2a1d   :  { %3555 = vtanh.f32 %v1953_v34  ;;  %v2847_v38 = vmul.f32 -1.442695, %v1953_v34 }
0x2a1f   :  { %3557 = vpow2.f32 %v2847_v38 }
0x2a27   :  { %v3556_v36 = vpop.eup %3555 }
0x2a28   :  { %1965 = vrot.lane.b32.xlu0 %v3556_v36, %s3622_s22 }
0x2a29   :  { %v3558_v39 = vpop.eup %3557 }
0x2a2a   :  { %v1959_v40 = vadd.f32 1.0, %v3558_v39 }
0x2a2c   :  { %3559 = vrcp.f32 %v1959_v40 }
0x2a36   :  { %v3560_v41 = vpop.eup %3559 }
0x2a37   :  { %v1963_v44 = vmul.f32 %v3560_v41, %v1872_v29 }
0x2a9a   :  { %v1966_v42 = vpop.permute.xlu0 %1965 }
0x2a9b   :  { %v1968_v43 = vmul.f32 %v3560_v41, %v1966_v42 }
0x2a9d   :  { %1970 = vrot.lane.b32.xlu1 %v1968_v43, %s3623_s3 }
0x2b0f   :  { %v1971_v45 = vpop.permute.xlu1 %1970 }
0x2b10   :  { %v1973_v13 = vadd.f32 %v1971_v45, %v1963_v44 }
0x2b12   :  { %3561 = vtanh.f32 %v1973_v13 }
0x2b1c   :  { %v3562_v48 = vpop.eup %3561 }
0x2b1d   :  { %1976 = vrot.lane.b32.xlu0 %v3562_v48, %s3622_s22 }
0x2b8f   :  { %v1977_v49 = vpop.permute.xlu0 %1976 }
0x2b90   :  { %v1979_v51 = vmul.f32 %v3560_v41, %v1977_v49 }
0x2b92   :  { %1981 = vrot.lane.b32.xlu1 %v1979_v51, %s3623_s3 }
0x2c04   :  { %v1982_v52 = vpop.permute.xlu1 %1981 }
0x2c05   :  { %1984 = vst.msk [vmem:[#allocation2 + $0xe] sm:$0x3] %vm1276_vm3, %v1982_v52  ;;  %3202 = vmatmul.mubr.msk.f32.vlgmr.msra.gmra.mrb[22].mxu1 %vm128_vm2, %v1982_v52 }
0x2c06   :  { %3394 = vmatpush3.bf16.msra.mxu1 %v3868_v63  ;;  %3223 = vmatprep.mubr.msk.f32.mxu1 %vm3620_vm1, %v3621_v4 }
0x2c07   :  { %3395 = vmatprep.subr.bf16.mxu1 %v3619_v3 }
0x2c0a   :  { %3397 = vmatpush3.bf16.msra.mxu1 %v3872_v6 }
0x2c0b   :  { %3404 = vmatprep.subr.bf16.mxu1 %v3619_v3 }
0x2cd8   :  { %v2053_v53 = vpop.f32.mrb[22].mxu1 }
0x2cd9   :  { %v2054_v55 = vadd.f32 %v2053_v53, %v3903_v37  ;;  %v3203_v56 = vpop.f32.mrb[23].mxu1 }
0x2cdb   :  { %3563 = vtanh.f32 %v2054_v55  ;;  %v2849_v58 = vmul.f32 -1.442695, %v2054_v55 }
0x2cdd   :  { %3565 = vpow2.f32 %v2849_v58 }
0x2ce5   :  { %v3564_v8 = vpop.eup %3563 }
0x2ce6   :  { %2066 = vrot.lane.b32.xlu0 %v3564_v8, %s3622_s22 }
0x2ce7   :  { %v3566_v59 = vpop.eup %3565 }
0x2ce8   :  { %v2060_v60 = vadd.f32 1.0, %v3566_v59 }
0x2cea   :  { %3567 = vrcp.f32 %v2060_v60 }
0x2cf4   :  { %v3568_v61 = vpop.eup %3567 }
0x2cf5   :  { %v2064_v0 = vmul.f32 %v3568_v61, %v1973_v13 }
0x2d58   :  { %v2067_v10 = vpop.permute.xlu0 %2066 }
0x2d59   :  { %v2069_v62 = vmul.f32 %v3568_v61, %v2067_v10 }
0x2d5b   :  { %2071 = vrot.lane.b32.xlu1 %v2069_v62, %s3623_s3 }
0x2dcd   :  { %v2072_v1 = vpop.permute.xlu1 %2071 }
0x2dce   :  { %v2074_v2 = vadd.f32 %v2072_v1, %v2064_v0 }
0x2dd0   :  { %3569 = vtanh.f32 %v2074_v2 }
0x2dda   :  { %v3570_v5 = vpop.eup %3569 }
0x2ddb   :  { %2077 = vrot.lane.b32.xlu0 %v3570_v5, %s3622_s22 }
0x2e4d   :  { %v2078_v7 = vpop.permute.xlu0 %2077 }
0x2e4e   :  { %v2080_v9 = vmul.f32 %v3568_v61, %v2078_v7 }
0x2e50   :  { %2082 = vrot.lane.b32.xlu1 %v2080_v9, %s3623_s3 }
0x2ec2   :  { %v2083_v11 = vpop.permute.xlu1 %2082 }
0x2ec3   :  { %2085 = vst.msk [vmem:[#allocation2 + $0x10] sm:$0x3] %vm1276_vm3, %v2083_v11  ;;  %3213 = vmatmul.mubr.msk.f32.vlgmr.msra.gmra.mrb[18].mxu0 %vm128_vm2, %v2083_v11 }
0x2ec4   :  { %3400 = vmatpush3.bf16.msra.mxu0 %v3868_v63  ;;  %3234 = vmatprep.mubr.msk.f32.mxu0 %vm3620_vm1, %v3621_v4 }
0x2ec5   :  { %3401 = vmatprep.subr.bf16.mxu0 %v3619_v3 }
0x2ec8   :  { %3403 = vmatpush3.bf16.msra.mxu0 %v3872_v6 }
0x2ec9   :  { %3410 = vmatprep.subr.bf16.mxu0 %v3619_v3 }
0x2f96   :  { %v2154_v14 = vpop.f32.mrb[18].mxu0 }
0x2f97   :  { %v2155_v16 = vadd.f32 %v2154_v14, %v3903_v37  ;;  %v3214_v17 = vpop.f32.mrb[19].mxu0 }
0x2f99   :  { %3571 = vtanh.f32 %v2155_v16  ;;  %v2851_v19 = vmul.f32 -1.442695, %v2155_v16 }
0x2f9b   :  { %3573 = vpow2.f32 %v2851_v19 }
0x2fa3   :  { %v3572_v18 = vpop.eup %3571 }
0x2fa4   :  { %2167 = vrot.lane.b32.xlu0 %v3572_v18, %s3622_s22 }
0x2fa5   :  { %v3574_v20 = vpop.eup %3573 }
0x2fa6   :  { %v2161_v21 = vadd.f32 1.0, %v3574_v20 }
0x2fa8   :  { %3575 = vrcp.f32 %v2161_v21 }
0x2fb2   :  { %v3576_v22 = vpop.eup %3575 }
0x2fb3   :  { %v2165_v25 = vmul.f32 %v3576_v22, %v2074_v2 }
0x3016   :  { %v2168_v23 = vpop.permute.xlu0 %2167 }
0x3017   :  { %v2170_v24 = vmul.f32 %v3576_v22, %v2168_v23  ;;  %v3422_v23 = vpack.c.bf16 %v3819_v47, %v3814_v46  ;;  %v2695_v46 = vld [vmem:[#allocation2 + $0x8] sm:$0xff] }
0x3019   :  { %2172 = vrot.lane.b32.xlu1 %v2170_v24, %s3623_s3 }
0x308b   :  { %v2173_v26 = vpop.permute.xlu1 %2172 }
0x308c   :  { %v2175_v27 = vadd.f32 %v2173_v26, %v2165_v25 }
0x308e   :  { %3577 = vtanh.f32 %v2175_v27 }
0x3098   :  { %v3578_v28 = vpop.eup %3577 }
0x3099   :  { %2178 = vrot.lane.b32.xlu0 %v3578_v28, %s3622_s22 }
0x310b   :  { %v2179_v29 = vpop.permute.xlu0 %2178 }
0x310c   :  { %v2181_v15 = vmul.f32 %v3576_v22, %v2179_v29  ;;  %v2694_v29 = vld [vmem:[#allocation2] sm:$0xff] }
0x310e   :  { %2183 = vrot.lane.b32.xlu1 %v2181_v15, %s3623_s3 }
0x3180   :  { %v2184_v30 = vpop.permute.xlu1 %2183 }
0x3181   :  { %2186 = vst.msk [vmem:[#allocation2 + $0x12] sm:$0x3] %vm1276_vm3, %v2184_v30  ;;  %3224 = vmatmul.mubr.msk.f32.vlgmr.msra.gmra.mrb[24].mxu1 %vm128_vm2, %v2184_v30  ;;  %v2701_v30 = vrot.slane %v3861_v57, %v3883_v12 }
0x3182   :  { %3406 = vmatpush3.bf16.msra.mxu1 %v3868_v63  ;;  %3245 = vmatprep.mubr.msk.f32.mxu1 %vm3620_vm1, %v3621_v4 }
0x3183   :  { %3407 = vmatprep.subr.bf16.mxu1 %v3619_v3 }
0x3186   :  { %3409 = vmatpush3.bf16.msra.mxu1 %v3872_v6 }
0x3187   :  { %3416 = vmatprep.subr.bf16.mxu1 %v3619_v3 }
0x3254   :  { %v2255_v31 = vpop.f32.mrb[24].mxu1 }
0x3255   :  { %v2256_v32 = vadd.f32 %v2255_v31, %v3903_v37  ;;  %v3225_v33 = vpop.f32.mrb[25].mxu1 }
0x3257   :  { %3579 = vtanh.f32 %v2256_v32  ;;  %v2853_v35 = vmul.f32 -1.442695, %v2256_v32 }
0x3259   :  { %3581 = vpow2.f32 %v2853_v35 }
0x3261   :  { %v3580_v34 = vpop.eup %3579 }
0x3262   :  { %2268 = vrot.lane.b32.xlu0 %v3580_v34, %s3622_s22 }
0x3263   :  { %v3582_v36 = vpop.eup %3581 }
0x3264   :  { %v2262_v38 = vadd.f32 1.0, %v3582_v36 }
0x3266   :  { %3583 = vrcp.f32 %v2262_v38 }
0x3270   :  { %v3584_v39 = vpop.eup %3583 }
0x3271   :  { %v2266_v42 = vmul.f32 %v3584_v39, %v2175_v27  ;;  %v3426_v27 = vpack.c.bf16 %v3848_v54, %v3832_v50 }
0x32d4   :  { %v2269_v40 = vpop.permute.xlu0 %2268 }
0x32d5   :  { %v2271_v41 = vmul.f32 %v3584_v39, %v2269_v40 }
0x32d7   :  { %2273 = vrot.lane.b32.xlu1 %v2271_v41, %s3623_s3 }
0x3349   :  { %v2274_v43 = vpop.permute.xlu1 %2273 }
0x334a   :  { %v2276_v44 = vadd.f32 %v2274_v43, %v2266_v42 }
0x334c   :  { %3585 = vtanh.f32 %v2276_v44 }
0x3356   :  { %v3586_v45 = vpop.eup %3585 }
0x3357   :  { %2279 = vrot.lane.b32.xlu0 %v3586_v45, %s3622_s22 }
0x33c9   :  { %v2280_v13 = vpop.permute.xlu0 %2279 }
0x33ca   :  { %v2282_v48 = vmul.f32 %v3584_v39, %v2280_v13 }
0x33cc   :  { %2284 = vrot.lane.b32.xlu1 %v2282_v48, %s3623_s3 }
0x343e   :  { %v2285_v49 = vpop.permute.xlu1 %2284 }
0x343f   :  { %2287 = vst.msk [vmem:[#allocation2 + $0x14] sm:$0x3] %vm1276_vm3, %v2285_v49  ;;  %3235 = vmatmul.mubr.msk.f32.vlgmr.msra.gmra.mrb[20].mxu0 %vm128_vm2, %v2285_v49 }
0x3440   :  { %3412 = vmatpush3.bf16.msra.mxu0 %v3868_v63  ;;  %3256 = vmatprep.mubr.msk.f32.mxu0 %vm3620_vm1, %v3621_v4 }
0x3441   :  { %3413 = vmatprep.subr.bf16.mxu0 %v3619_v3 }
0x3444   :  { %3415 = vmatpush3.bf16.msra.mxu0 %v3872_v6 }
0x3445   :  { %3423 = vmatprep.subr.bf16.mxu0 %v3422_v23 }
0x3512   :  { %v2356_v51 = vpop.f32.mrb[20].mxu0 }
0x3513   :  { %v2357_v52 = vadd.f32 %v2356_v51, %v3903_v37  ;;  %v3236_v53 = vpop.f32.mrb[21].mxu0 }
0x3515   :  { %3587 = vtanh.f32 %v2357_v52  ;;  %v2855_v56 = vmul.f32 -1.442695, %v2357_v52 }
0x3517   :  { %3589 = vpow2.f32 %v2855_v56 }
0x351f   :  { %v3588_v55 = vpop.eup %3587 }
0x3520   :  { %2369 = vrot.lane.b32.xlu0 %v3588_v55, %s3622_s22 }
0x3521   :  { %v3590_v8 = vpop.eup %3589 }
0x3522   :  { %v2363_v58 = vadd.f32 1.0, %v3590_v8 }
0x3524   :  { %3591 = vrcp.f32 %v2363_v58 }
0x352e   :  { %v3592_v59 = vpop.eup %3591 }
0x352f   :  { %v2367_v10 = vmul.f32 %v3592_v59, %v2276_v44 }
0x3592   :  { %v2370_v60 = vpop.permute.xlu0 %2369 }
0x3593   :  { %v2372_v61 = vmul.f32 %v3592_v59, %v2370_v60 }
0x3595   :  { %2374 = vrot.lane.b32.xlu1 %v2372_v61, %s3623_s3 }
0x3607   :  { %v2375_v62 = vpop.permute.xlu1 %2374 }
0x3608   :  { %v2377_v0 = vadd.f32 %v2375_v62, %v2367_v10 }
0x360a   :  { %3593 = vtanh.f32 %v2377_v0 }
0x3614   :  { %v3594_v1 = vpop.eup %3593 }
0x3615   :  { %2380 = vrot.lane.b32.xlu0 %v3594_v1, %s3622_s22 }
0x3687   :  { %v2381_v2 = vpop.permute.xlu0 %2380 }
0x3688   :  { %v2383_v5 = vmul.f32 %v3592_v59, %v2381_v2 }
0x368a   :  { %2385 = vrot.lane.b32.xlu1 %v2383_v5, %s3623_s3 }
0x36fc   :  { %v2386_v7 = vpop.permute.xlu1 %2385 }
0x36fd   :  { %2388 = vst.msk [vmem:[#allocation2 + $0x16] sm:$0x3] %vm1276_vm3, %v2386_v7  ;;  %3246 = vmatmul.mubr.msk.f32.vlgmr.msra.gmra.mrb[26].mxu1 %vm128_vm2, %v2386_v7 }
0x36fe   :  { %3418 = vmatpush3.bf16.msra.mxu1 %v3868_v63  ;;  %3267 = vmatprep.mubr.msk.f32.mxu1 %vm3620_vm1, %v3621_v4 }
0x36ff   :  { %3419 = vmatprep.subr.bf16.mxu1 %v3619_v3 }
0x3702   :  { %3421 = vmatpush3.bf16.msra.mxu1 %v3872_v6 }
0x3704   :  { %v2696_v47 = vld [vmem:[#allocation2 + $0x10] sm:$0xff] }
0x37d0   :  { %v2457_v9 = vpop.f32.mrb[26].mxu1 }
0x37d1   :  { %v2458_v11 = vadd.f32 %v2457_v9, %v3903_v37  ;;  %v3247_v14 = vpop.f32.mrb[27].mxu1 }
0x37d3   :  { %3595 = vtanh.f32 %v2458_v11  ;;  %v2857_v17 = vmul.f32 -1.442695, %v2458_v11 }
0x37d5   :  { %3597 = vpow2.f32 %v2857_v17 }
0x37dd   :  { %v3596_v16 = vpop.eup %3595 }
0x37de   :  { %2470 = vrot.lane.b32.xlu0 %v3596_v16, %s3622_s22 }
0x37df   :  { %v3598_v18 = vpop.eup %3597 }
0x37e0   :  { %v2464_v19 = vadd.f32 1.0, %v3598_v18 }
0x37e2   :  { %3599 = vrcp.f32 %v2464_v19 }
0x37ec   :  { %v3600_v63 = vpop.eup %3599 }
0x37ed   :  { %v2468_v3 = vmul.f32 %v3600_v63, %v2377_v0 }
0x3850   :  { %v2471_v20 = vpop.permute.xlu0 %2470 }
0x3851   :  { %v2473_v21 = vmul.f32 %v3600_v63, %v2471_v20 }
0x3853   :  { %2475 = vrot.lane.b32.xlu1 %v2473_v21, %s3623_s3 }
0x38c5   :  { %v2476_v6 = vpop.permute.xlu1 %2475 }
0x38c6   :  { %v2478_v22 = vadd.f32 %v2476_v6, %v2468_v3 }
0x38c8   :  { %3601 = vtanh.f32 %v2478_v22 }
0x38d2   :  { %v3602_v24 = vpop.eup %3601 }
0x38d3   :  { %2481 = vrot.lane.b32.xlu0 %v3602_v24, %s3622_s22 }
0x3945   :  { %v2482_v25 = vpop.permute.xlu0 %2481 }
0x3946   :  { %v2484_v26 = vmul.f32 %v3600_v63, %v2482_v25 }
0x3948   :  { %2486 = vrot.lane.b32.xlu1 %v2484_v26, %s3623_s3 }
0x39ba   :  { %v2487_v28 = vpop.permute.xlu1 %2486 }
0x39bb   :  { %2489 = vst.msk [vmem:[#allocation2 + $0x18] sm:$0x3] %vm1276_vm3, %v2487_v28  ;;  %3257 = vmatmul.mubr.msk.f32.vlgmr.msra.gmra.mrb[22].mxu0 %vm128_vm2, %v2487_v28 }
0x39bc   :  { %3425 = vmatpush3.bf16.msra.mxu0 %v3422_v23  ;;  %3278 = vmatprep.mubr.msk.f32.mxu0 %vm128_vm2, %v2694_v29 }
0x39bd   :  { %3427 = vmatprep.subr.bf16.mxu0 %v3426_v27 }
0x39c0   :  { %3429 = vmatpush3.bf16.msra.mxu0 %v3426_v27 }
0x39c3   :  { %3279 = vmatmul.mubr.msk.f32.vlgmr.msra.gmra.mrb[24].mxu0 %vm128_vm2, %v2695_v46 }
0x39c4   :  { %3281 = vmatprep.mubr.msk.f32.mxu0 %vm128_vm2, %v2696_v47 }
0x3a8e   :  { %v2558_v50 = vpop.f32.mrb[22].mxu0 }
0x3a8f   :  { %v2559_v54 = vadd.f32 %v2558_v50, %v3903_v37  ;;  %v3258_v15 = vpop.f32.mrb[23].mxu0 }
0x3a91   :  { %3603 = vtanh.f32 %v2559_v54  ;;  %v2859_v35 = vmul.f32 -1.442695, %v2559_v54 }
0x3a93   :  { %3605 = vpow2.f32 %v2859_v35 }
0x3a96   :  { %v3280_v31 = vpop.f32.mrb[24].mxu0 }
0x3a97   :  { %v2787_v32 = vadd.f32 %v3280_v31, %v2701_v30  ;;  %v2781_v33 = vpop.f32.mrb[25].mxu0 }
0x3a98   :  { %v2782_v34 = vadd.f32 %v2781_v33, %v2701_v30 }
0x3a99   :  { %2801 = vst.msk [vmem:[%s4104_s9 + $0xa] sm:$0xff] %vm46_vm0, %v2787_v32 }
0x3a9a   :  { %2800 = vst.msk [vmem:[%s4104_s9 + $0x2] sm:$0xff] %vm46_vm0, %v2782_v34 }
0x3a9b   :  { %v3604_v4 = vpop.eup %3603 }
0x3a9c   :  { %2571 = vrot.lane.b32.xlu0 %v3604_v4, %s3622_s22 }
0x3a9d   :  { %v3606_v57 = vpop.eup %3605 }
0x3a9e   :  { %v2565_v12 = vadd.f32 1.0, %v3606_v57 }
0x3aa0   :  { %3607 = vrcp.f32 %v2565_v12 }
0x3aaa   :  { %v3608_v36 = vpop.eup %3607 }
0x3aab   :  { %v2569_v40 = vmul.f32 %v3608_v36, %v2478_v22 }
0x3b0e   :  { %v2572_v38 = vpop.permute.xlu0 %2571 }
0x3b0f   :  { %v2574_v39 = vmul.f32 %v3608_v36, %v2572_v38 }
0x3b11   :  { %2576 = vrot.lane.b32.xlu1 %v2574_v39, %s3623_s3 }
0x3b83   :  { %v2577_v41 = vpop.permute.xlu1 %2576 }
0x3b84   :  { %v2579_v42 = vadd.f32 %v2577_v41, %v2569_v40 }
0x3b86   :  { %3609 = vtanh.f32 %v2579_v42 }
0x3b90   :  { %v3610_v43 = vpop.eup %3609 }
0x3b91   :  { %2582 = vrot.lane.b32.xlu0 %v3610_v43, %s3622_s22 }
0x3c03   :  { %v2583_v44 = vpop.permute.xlu0 %2582 }
0x3c04   :  { %v2585_v45 = vmul.f32 %v3608_v36, %v2583_v44 }
0x3c06   :  { %2587 = vrot.lane.b32.xlu1 %v2585_v45, %s3623_s3 }
0x3c78   :  { %v2588_v13 = vpop.permute.xlu1 %2587 }
0x3c79   :  { %2590 = vst.msk [vmem:[#allocation2 + $0x1a] sm:$0x3] %vm1276_vm3, %v2588_v13  ;;  %3268 = vmatmul.mubr.msk.f32.vlgmr.msra.gmra.mrb[28].mxu1 %vm128_vm2, %v2588_v13 }
0x3d4c   :  { %v2659_v48 = vpop.f32.mrb[28].mxu1 }
0x3d4d   :  { %v2660_v49 = vadd.f32 %v2659_v48, %v3903_v37  ;;  %v3269_v51 = vpop.f32.mrb[29].mxu1 }
0x3d4f   :  { %3611 = vtanh.f32 %v2660_v49  ;;  %v2861_v53 = vmul.f32 -1.442695, %v2660_v49 }
0x3d51   :  { %3613 = vpow2.f32 %v2861_v53 }
0x3d59   :  { %v3612_v52 = vpop.eup %3611 }
0x3d5a   :  { %2672 = vrot.lane.b32.xlu0 %v3612_v52, %s3622_s22 }
0x3d5b   :  { %v3614_v55 = vpop.eup %3613 }
0x3d5c   :  { %v2666_v56 = vadd.f32 1.0, %v3614_v55 }
0x3d5e   :  { %3615 = vrcp.f32 %v2666_v56 }
0x3d68   :  { %v3616_v8 = vpop.eup %3615 }
0x3d69   :  { %v2670_v60 = vmul.f32 %v3616_v8, %v2579_v42 }
0x3dcc   :  { %v2673_v58 = vpop.permute.xlu0 %2672 }
0x3dcd   :  { %v2675_v59 = vmul.f32 %v3616_v8, %v2673_v58 }
0x3dcf   :  { %2677 = vrot.lane.b32.xlu1 %v2675_v59, %s3623_s3 }
0x3e41   :  { %v2678_v61 = vpop.permute.xlu1 %2677 }
0x3e42   :  { %v2680_v10 = vadd.f32 %v2678_v61, %v2670_v60 }
0x3e44   :  { %3617 = vtanh.f32 %v2680_v10 }
0x3e4e   :  { %v3618_v37 = vpop.eup %3617 }
0x3e4f   :  { %2683 = vrot.lane.b32.xlu0 %v3618_v37, %s3622_s22 }
0x3ec1   :  { %v2684_v62 = vpop.permute.xlu0 %2683 }
0x3ec2   :  { %v2686_v0 = vmul.f32 %v3616_v8, %v2684_v62 }
0x3ec4   :  { %2688 = vrot.lane.b32.xlu1 %v2686_v0, %s3623_s3 }
0x3f36   :  { %v2689_v1 = vpop.permute.xlu1 %2688 }
0x3f37   :  { %2691 = vst.msk [vmem:[#allocation2 + $0x1c] sm:$0x3] %vm1276_vm3, %v2689_v1 }
0x3f3e   :  { %v2697_v2 = vld [vmem:[#allocation2 + $0x18] sm:$0x3f] }
0x3f3f   :  { %3282 = vmatmul.mubr.msk.f32.gmra.mrb[26].mxu0 %vm128_vm2, %v2697_v2 }
0x4012   :  { %v3283_v5 = vpop.f32.mrb[26].mxu0 }
0x4013   :  { %v2797_v7 = vadd.f32 %v3283_v5, %v2701_v30  ;;  %v2791_v9 = vpop.f32.mrb[27].mxu0 }
0x4014   :  { %v2792_v11 = vadd.f32 %v2791_v9, %v2701_v30 }
0x4015   :  { %2804 = vst.msk [vmem:[%s4104_s9 + $0x1a] sm:$0x3f] %vm2803_vm5, %v2797_v7 }
0x4016   :  { %2802 = vst.msk [vmem:[%s4104_s9 + $0x12] sm:$0xff] %vm46_vm0, %v2792_v11 }

</bundles_post_ra>
